<compile_context>
chip_gen: v6e
topology: v6e:2x2x1
jax: 0.10.0
libtpu: 0.0.40
codegen_flags: <defaults>
</compile_context>

<pallas_src>
import jax
import jax.numpy as jnp
from jax.experimental import pallas as pl
from jax.experimental.pallas import tpu as pltpu

_LANE = 128      # lane width: last dims padded to a multiple of this
_LN_EPS = 1e-5   # PyTorch nn.LayerNorm default


def _round_up(v, m):
    return ((v + m - 1) // m) * m


def _pad_axis(a, axis, target):
    pad = target - a.shape[axis]
    if pad == 0:
        return a
    widths = [(0, 0)] * a.ndim
    widths[axis] = (0, pad)
    return jnp.pad(a, widths)


def _mxu_dot(a, b, mxu_dtype):
    # bf16 (or f32) MXU inputs, f32 accumulation. astype is a no-op when the
    # operand is already in mxu_dtype (adj / x / W arrive pre-cast from the host).
    return jnp.dot(a.astype(mxu_dtype), b.astype(mxu_dtype),
                   preferred_element_type=jnp.float32)


def _make_gcn_kernel(true_out_feats, agg_first_flags, mxu_dtype):
    """Build a kernel that runs the whole GraphConvolution stack for one batch."""
    n_layers = len(true_out_feats)

    def kernel(x_ref, adj_ref, *rest):
        w_refs = rest[:n_layers]
        o_ref = rest[n_layers]

        adj = adj_ref[0]            # (Np, Np), bf16 (pre-cast on host)
        h = x_ref[0]                # (Np, F_in_pad), bf16 (pre-cast on host)

        for w_ref, f_out, agg_first in zip(w_refs, true_out_feats, agg_first_flags):
            w = w_ref[...]          # (F_in_pad, F_out_pad), bf16, zero-padded
            if agg_first:
                # (adj @ h) @ W : fewer FLOPs when F_out >= F_in
                tmp = _mxu_dot(adj, h, mxu_dtype)
                out = _mxu_dot(tmp, w, mxu_dtype)
            else:
                # adj @ (h @ W) : fewer FLOPs when F_out < F_in
                tmp = _mxu_dot(h, w, mxu_dtype)
                out = _mxu_dot(adj, tmp, mxu_dtype)

            # LayerNorm over the *true* F_out features, then ReLU, in f32.
            # Padded output lanes of `out` are exact zeros (W's padded rows/cols
            # are zero), so plain lane sums divided by the true count give the
            # exact mean / E[x^2].
            inv_n = 1.0 / float(f_out)
            mean = jnp.sum(out, axis=-1, keepdims=True) * inv_n
            ex2 = jnp.sum(out * out, axis=-1, keepdims=True) * inv_n
            # Clamp: one-pass variance can go slightly negative via f32 cancellation.
            var = jnp.maximum(ex2 - mean * mean, 0.0)
            h = jnp.maximum((out - mean) * jax.lax.rsqrt(var + _LN_EPS), 0.0)
            # NOTE: padded feature lanes of h are generally non-zero after LN+ReLU;
            # harmless because the next layer's padded weight rows are zero and the
            # wrapper slices the final output.

        o_ref[0] = h.astype(o_ref.dtype)

    return kernel


def gcn_forward(x, adj, weights, mxu_dtype=jnp.bfloat16):
    """x: (B, N, F0) f32; adj: (B, N, N) f32; weights: PyTorch-style (F_out, F_in) list."""
    B, N, F0 = x.shape
    assert adj.shape == (B, N, N)
    out_feats = [int(w.shape[0]) for w in weights]
    in_feats = [F0] + out_feats[:-1]
    for w, fi in zip(weights, in_feats):
        assert int(w.shape[1]) == fi

    # Contract against the narrower feature dim first.
    agg_first = [fo >= fi for fi, fo in zip(in_feats, out_feats)]

    # Pad nodes AND feature dims to lane (128) multiples: adj's last axis and every
    # feature axis are lane dims -> lane-dense loads / unmasked stores.
    np_ = _round_up(N, _LANE)
    in_feats_p = [_round_up(f, _LANE) for f in in_feats]
    out_feats_p = [_round_up(f, _LANE) for f in out_feats]

    # Pre-cast everything the MXU consumes to bf16 on the host (halves adj DMA,
    # removes all in-kernel casts on the input operands).
    x_p = _pad_axis(_pad_axis(x, 1, np_), 2, in_feats_p[0]).astype(mxu_dtype)
    adj_p = _pad_axis(_pad_axis(adj, 1, np_), 2, np_).astype(mxu_dtype)
    # Pre-transpose weights to (F_in, F_out) on the host, zero-pad, pre-cast.
    w_p = [_pad_axis(_pad_axis(w.T, 0, fip), 1, fop).astype(mxu_dtype)
           for w, fip, fop in zip(weights, in_feats_p, out_feats_p)]

    fo_p = out_feats_p[-1]
    kernel = _make_gcn_kernel(out_feats, agg_first, mxu_dtype)

    in_specs = [
        pl.BlockSpec((1, np_, in_feats_p[0]), lambda b: (b, 0, 0)),
        pl.BlockSpec((1, np_, np_), lambda b: (b, 0, 0)),
    ]
    # Constant index_map -> each weight block is fetched once, not per grid step.
    in_specs += [pl.BlockSpec((fip, fop), lambda b: (0, 0))
                 for fip, fop in zip(in_feats_p, out_feats_p)]

    # Explicit scoped-VMEM budget: double-buffered bf16 blocks + f32 output block
    # + weights + working intermediates, with margin; capped below v7x's 64 MiB
    # physical VMEM so the same limit is safe on every generation.
    itemsize = jnp.dtype(mxu_dtype).itemsize
    max_feat = max(in_feats_p + out_feats_p)
    need = (2 * np_ * np_ * itemsize                      # adj (double-buffered)
            + 2 * np_ * in_feats_p[0] * itemsize          # x
            + 2 * np_ * fo_p * 4                          # output (f32)
            + 2 * sum(fip * fop * itemsize
                      for fip, fop in zip(in_feats_p, out_feats_p))
            + 4 * np_ * max_feat * 4)                     # in-kernel f32 temporaries
    vmem_limit = int(min(max(need * 2, 16 << 20), 56 << 20))

    out_p = pl.pallas_call(
        kernel,
        out_shape=jax.ShapeDtypeStruct((B, np_, fo_p), x.dtype),
        grid_spec=pltpu.PrefetchScalarGridSpec(
            num_scalar_prefetch=0,
            grid=(B,),
            in_specs=in_specs,
            out_specs=pl.BlockSpec((1, np_, fo_p), lambda b: (b, 0, 0)),
        ),
        compiler_params=pltpu.CompilerParams(
            dimension_semantics=("parallel",),   # v7x: one batch per TensorCore
            vmem_limit_bytes=vmem_limit),
    )(x_p, adj_p, *w_p)

    return out_p[:, :N, :out_feats[-1]]


def _reference(x, adj, weights):
    """Pure-JAX f32 reference of GCN.forward (eval mode)."""
    h = x
    for w in weights:
        support = jnp.einsum("bnf,of->bno", h, w)          # x @ W.T
        out = jnp.einsum("bnm,bmo->bno", adj, support)     # bmm(adj, support)
        mean = jnp.mean(out, axis=-1, keepdims=True)
        var = jnp.mean((out - mean) ** 2, axis=-1, keepdims=True)
        h = jnp.maximum((out - mean) * jax.lax.rsqrt(var + _LN_EPS), 0.0)
    return h


def _init_linear_weight(key, out_features, in_features):
    # Matches PyTorch nn.Linear default init bound: U(-1/sqrt(fan_in), 1/sqrt(fan_in))
    bound = 1.0 / jnp.sqrt(jnp.float32(in_features))
    return jax.random.uniform(key, (out_features, in_features), jnp.float32,
                              minval=-bound, maxval=bound)


if __name__ == "__main__":
    # Small shapes: batch=2, nodes=8, input_size=16, hidden_size=32, num_classes=8
    B, N = 2, 8
    input_size, hidden_size, num_classes = 16, 32, 8

    key = jax.random.PRNGKey(0)
    kx, kadj, kw1, kw2 = jax.random.split(key, 4)

    x = jax.random.normal(kx, (B, N, input_size), dtype=jnp.float32)
    adj = jax.random.uniform(kadj, (B, N, N), dtype=jnp.float32)
    adj = adj / jnp.sum(adj, axis=-1, keepdims=True)   # row-normalized adjacency

    # GCN(input_size, hidden_size, num_classes, num_layers=1) has exactly 2 GraphConvolutions
    w1 = _init_linear_weight(kw1, hidden_size, input_size)   # (32, 16)
    w2 = _init_linear_weight(kw2, num_classes, hidden_size)  # (8, 32)

    out = gcn_forward(x, adj, [w1, w2])
    out = jax.block_until_ready(out)

    assert out.shape == (B, N, num_classes), out.shape
    assert bool(jnp.all(jnp.isfinite(out)))

    # Loose check vs. a pure-JAX f32 reference (kernel feeds the MXU bf16 operands).
    ref = _reference(x, adj, [w1, w2])
    max_err = float(jnp.max(jnp.abs(out - ref)))
    assert max_err < 0.35, f"max abs error vs reference: {max_err}"

    print("KERNEL_OK")
</pallas_src>

<mosaic_0001>
module attributes {stable_mosaic.version = 11 : i64} {
  func.func @kernel(%arg0: i32, %arg1: memref<1x128x128xbf16, #tpu.memory_space<vmem>>, %arg2: memref<1x128x128xbf16, #tpu.memory_space<vmem>>, %arg3: memref<128x128xbf16, #tpu.memory_space<vmem>>, %arg4: memref<128x128xbf16, #tpu.memory_space<vmem>>, %arg5: memref<1x128x128xf32, #tpu.memory_space<vmem>>) attributes {dimension_semantics = [#tpu.dimension_semantics<parallel>], iteration_bounds = array<i64: 2>, scalar_prefetch = 0 : i64, scratch_operands = 0 : i64, tpu.core_type = #tpu.core_type<tc>, window_params = [{transform_indices = @transform_0, window_bounds = array<i64: 1, 128, 128>}, {transform_indices = @transform_1, window_bounds = array<i64: 1, 128, 128>}, {pipeline_mode = #tpu.pipeline_mode<synchronous>, transform_indices = @transform_2, window_bounds = array<i64: 128, 128>}, {pipeline_mode = #tpu.pipeline_mode<synchronous>, transform_indices = @transform_3, window_bounds = array<i64: 128, 128>}, {transform_indices = @transform_4, window_bounds = array<i64: 1, 128, 128>}]} {
    %c0 = arith.constant 0 : index
    %c0_0 = arith.constant 0 : index
    %c0_1 = arith.constant 0 : index
    %0 = vector.load %arg2[%c0, %c0_0, %c0_1] : memref<1x128x128xbf16, #tpu.memory_space<vmem>>, vector<1x128x128xbf16>
    %1 = vector.shape_cast %0 : vector<1x128x128xbf16> to vector<128x128xbf16>
    %c0_2 = arith.constant 0 : index
    %c0_3 = arith.constant 0 : index
    %c0_4 = arith.constant 0 : index
    %2 = vector.load %arg1[%c0_2, %c0_3, %c0_4] : memref<1x128x128xbf16, #tpu.memory_space<vmem>>, vector<1x128x128xbf16>
    %3 = vector.shape_cast %2 : vector<1x128x128xbf16> to vector<128x128xbf16>
    %c0_5 = arith.constant 0 : index
    %c0_6 = arith.constant 0 : index
    %4 = vector.load %arg3[%c0_5, %c0_6] : memref<128x128xbf16, #tpu.memory_space<vmem>>, vector<128x128xbf16>
    %cst = arith.constant dense<0.000000e+00> : vector<128x128xf32>
    %5 = tpu.matmul %1, %3, %cst {dimension_numbers = #tpu.dot_dimension_numbers<[1], [0], [0], [1], [0, 0, 1, 1], [], []>} : vector<128x128xbf16>, vector<128x128xbf16>, vector<128x128xf32> -> vector<128x128xf32>
    %6 = arith.truncf %5 : vector<128x128xf32> to vector<128x128xbf16>
    %cst_7 = arith.constant dense<0.000000e+00> : vector<128x128xf32>
    %7 = tpu.matmul %6, %4, %cst_7 {dimension_numbers = #tpu.dot_dimension_numbers<[1], [0], [0], [1], [0, 0, 1, 1], [], []>} : vector<128x128xbf16>, vector<128x128xbf16>, vector<128x128xf32> -> vector<128x128xf32>
    %cst_8 = arith.constant dense<0.000000e+00> : vector<128xf32>
    %8 = vector.multi_reduction <add>, %7, %cst_8 [1] : vector<128x128xf32> to vector<128xf32>
    %9 = vector.shape_cast %8 : vector<128xf32> to vector<128x1xf32>
    %cst_9 = arith.constant 3.125000e-02 : f32
    %10 = vector.broadcast %cst_9 : f32 to vector<128x1xf32>
    %11 = arith.mulf %9, %10 : vector<128x1xf32>
    %12 = arith.mulf %7, %7 : vector<128x128xf32>
    %cst_10 = arith.constant dense<0.000000e+00> : vector<128xf32>
    %13 = vector.multi_reduction <add>, %12, %cst_10 [1] : vector<128x128xf32> to vector<128xf32>
    %14 = vector.shape_cast %13 : vector<128xf32> to vector<128x1xf32>
    %cst_11 = arith.constant 3.125000e-02 : f32
    %15 = vector.broadcast %cst_11 : f32 to vector<128x1xf32>
    %16 = arith.mulf %14, %15 : vector<128x1xf32>
    %17 = arith.mulf %11, %11 : vector<128x1xf32>
    %18 = arith.subf %16, %17 : vector<128x1xf32>
    %cst_12 = arith.constant 0.000000e+00 : f32
    %19 = vector.broadcast %cst_12 : f32 to vector<128x1xf32>
    %20 = arith.maximumf %18, %19 : vector<128x1xf32>
    %21 = vector.broadcast %11 : vector<128x1xf32> to vector<128x128xf32>
    %22 = arith.subf %7, %21 : vector<128x128xf32>
    %cst_13 = arith.constant 9.99999974E-6 : f32
    %23 = vector.broadcast %cst_13 : f32 to vector<128x1xf32>
    %24 = arith.addf %20, %23 : vector<128x1xf32>
    %25 = math.rsqrt %24 : vector<128x1xf32>
    %26 = vector.broadcast %25 : vector<128x1xf32> to vector<128x128xf32>
    %27 = arith.mulf %22, %26 : vector<128x128xf32>
    %cst_14 = arith.constant 0.000000e+00 : f32
    %28 = vector.broadcast %cst_14 : f32 to vector<128x128xf32>
    %29 = arith.maximumf %27, %28 : vector<128x128xf32>
    %c0_15 = arith.constant 0 : index
    %c0_16 = arith.constant 0 : index
    %30 = vector.load %arg4[%c0_15, %c0_16] : memref<128x128xbf16, #tpu.memory_space<vmem>>, vector<128x128xbf16>
    %31 = arith.truncf %29 : vector<128x128xf32> to vector<128x128xbf16>
    %cst_17 = arith.constant dense<0.000000e+00> : vector<128x128xf32>
    %32 = tpu.matmul %31, %30, %cst_17 {dimension_numbers = #tpu.dot_dimension_numbers<[1], [0], [0], [1], [0, 0, 1, 1], [], []>} : vector<128x128xbf16>, vector<128x128xbf16>, vector<128x128xf32> -> vector<128x128xf32>
    %33 = arith.truncf %32 : vector<128x128xf32> to vector<128x128xbf16>
    %cst_18 = arith.constant dense<0.000000e+00> : vector<128x128xf32>
    %34 = tpu.matmul %1, %33, %cst_18 {dimension_numbers = #tpu.dot_dimension_numbers<[1], [0], [0], [1], [0, 0, 1, 1], [], []>} : vector<128x128xbf16>, vector<128x128xbf16>, vector<128x128xf32> -> vector<128x128xf32>
    %cst_19 = arith.constant dense<0.000000e+00> : vector<128xf32>
    %35 = vector.multi_reduction <add>, %34, %cst_19 [1] : vector<128x128xf32> to vector<128xf32>
    %36 = vector.shape_cast %35 : vector<128xf32> to vector<128x1xf32>
    %cst_20 = arith.constant 1.250000e-01 : f32
    %37 = vector.broadcast %cst_20 : f32 to vector<128x1xf32>
    %38 = arith.mulf %36, %37 : vector<128x1xf32>
    %39 = arith.mulf %34, %34 : vector<128x128xf32>
    %cst_21 = arith.constant dense<0.000000e+00> : vector<128xf32>
    %40 = vector.multi_reduction <add>, %39, %cst_21 [1] : vector<128x128xf32> to vector<128xf32>
    %41 = vector.shape_cast %40 : vector<128xf32> to vector<128x1xf32>
    %cst_22 = arith.constant 1.250000e-01 : f32
    %42 = vector.broadcast %cst_22 : f32 to vector<128x1xf32>
    %43 = arith.mulf %41, %42 : vector<128x1xf32>
    %44 = arith.mulf %38, %38 : vector<128x1xf32>
    %45 = arith.subf %43, %44 : vector<128x1xf32>
    %cst_23 = arith.constant 0.000000e+00 : f32
    %46 = vector.broadcast %cst_23 : f32 to vector<128x1xf32>
    %47 = arith.maximumf %45, %46 : vector<128x1xf32>
    %48 = vector.broadcast %38 : vector<128x1xf32> to vector<128x128xf32>
    %49 = arith.subf %34, %48 : vector<128x128xf32>
    %cst_24 = arith.constant 9.99999974E-6 : f32
    %50 = vector.broadcast %cst_24 : f32 to vector<128x1xf32>
    %51 = arith.addf %47, %50 : vector<128x1xf32>
    %52 = math.rsqrt %51 : vector<128x1xf32>
    %53 = vector.broadcast %52 : vector<128x1xf32> to vector<128x128xf32>
    %54 = arith.mulf %49, %53 : vector<128x128xf32>
    %cst_25 = arith.constant 0.000000e+00 : f32
    %55 = vector.broadcast %cst_25 : f32 to vector<128x128xf32>
    %56 = arith.maximumf %54, %55 : vector<128x128xf32>
    %c0_26 = arith.constant 0 : index
    %c0_27 = arith.constant 0 : index
    %c0_28 = arith.constant 0 : index
    %57 = vector.load %arg5[%c0_26, %c0_27, %c0_28] : memref<1x128x128xf32, #tpu.memory_space<vmem>>, vector<1x128x128xf32>
    %58 = vector.shape_cast %57 : vector<1x128x128xf32> to vector<128x128xf32>
    %59 = vector.shape_cast %56 : vector<128x128xf32> to vector<1x128x128xf32>
    tpu.vector_store %arg5[%c0_26, %c0_27, %c0_28], %59 {strides = array<i32>} : memref<1x128x128xf32, #tpu.memory_space<vmem>>, vector<1x128x128xf32>,
    return
  }
  func.func @transform_0(%arg0: i32) -> (i32, i32, i32) {
    %c0_i32 = arith.constant 0 : i32
    %c0_i32_0 = arith.constant 0 : i32
    %c0_i32_1 = arith.constant 0 : i32
    return %arg0, %c0_i32, %c0_i32_0 : i32, i32, i32
  }
  func.func @transform_1(%arg0: i32) -> (i32, i32, i32) {
    %c0_i32 = arith.constant 0 : i32
    %c0_i32_0 = arith.constant 0 : i32
    %c0_i32_1 = arith.constant 0 : i32
    return %arg0, %c0_i32, %c0_i32_0 : i32, i32, i32
  }
  func.func @transform_2(%arg0: i32) -> (i32, i32) {
    %c0_i32 = arith.constant 0 : i32
    %c0_i32_0 = arith.constant 0 : i32
    %c0_i32_1 = arith.constant 0 : i32
    return %c0_i32, %c0_i32_0 : i32, i32
  }
  func.func @transform_3(%arg0: i32) -> (i32, i32) {
    %c0_i32 = arith.constant 0 : i32
    %c0_i32_0 = arith.constant 0 : i32
    %c0_i32_1 = arith.constant 0 : i32
    return %c0_i32, %c0_i32_0 : i32, i32
  }
  func.func @transform_4(%arg0: i32) -> (i32, i32, i32) {
    %c0_i32 = arith.constant 0 : i32
    %c0_i32_0 = arith.constant 0 : i32
    %c0_i32_1 = arith.constant 0 : i32
    return %arg0, %c0_i32, %c0_i32_0 : i32, i32, i32
  }
}

</mosaic_0001>

<bundles_post_ra>
// kernel: tpu_custom_call.1
= control target key start
LH: loop header
LB: loop body
LE: loop exit
PB: predicated region body
PF: predicated region fallthrough
CT: control target
= control target key end

     0   :  { %s2877_s0 = inlined_call_operand.hbm [shape: bf16[2,128,128], index: 0, kind: input, shape index: {}]   ;;  %s2878_s1 = inlined_call_operand.hbm [shape: bf16[2,128,128], index: 1, kind: input, shape index: {}]   ;;  %s2879_s2 = inlined_call_operand.hbm [shape: bf16[128,128], index: 2, kind: input, shape index: {}]   ;;  %s2880_s3 = inlined_call_operand.hbm [shape: bf16[128,128], index: 3, kind: input, shape index: {}]   ;;  %s2881_s4 = inlined_call_operand.hbm [shape: f32[2,128,128], index: 4, kind: output, shape index: {}]  }
   0x1   :  { %2889 = sst [smem:[#allocation16_spill]] %s2877_s0 }
   0x2   :  { %9 = vsyncpa [#allocation3], 0 }
   0x3   :  { %11 = vsyncpa [#allocation3 + $0x1], 0 }
   0x4   :  { %12 = vsyncpa [#allocation6], 0 }
   0x5   :  { %14 = vsyncpa [#allocation6 + $0x1], 0 }
   0x6   :  { %15 = vsyncpa [#allocation9], 0 }
   0x7   :  { %16 = vsyncpa [#allocation4], 0 }
   0x8   :  { %18 = vsyncpa [#allocation4 + $0x1], 0  ;;  %s2220_s15 = smov 0   ;;  %s2222_s16 = smov 0  }
   0x9   :  { %s2224_s17 = smov 0   ;;  %s2226_s18 = smov 0  }
   0xa LB: > { %s2241_s19 = sadd.s32 4294967295, %s2184_s18   ;;  %s1579_s20 = sadd.s32 4294967294, %s2184_s18   ;;  %s2184_s18 = sphi %s2226_s18, %s2910_s18   ;;  %s2180_s17 = sphi %s2224_s17, %s2909_s17   ;;  %s2176_s16 = sphi %s2222_s16, %s2908_s16   ;;  %s2172_s15 = sphi %s2220_s15, %s2907_s15  }
   0xb   : > { %p44_p0 = scmp.ne.s32.totalorder %s2176_s16, %s2172_s15  ;;  %p2886_p1 = scmp.eq.s32.totalorder %s2241_s19, 0 }
   0xc   : > { %p136_p2 = scmp.eq.s32.totalorder %s2241_s19, 1  ;;  %p142_p3 = scmp.eq.s32.totalorder %s1579_s20, 1 }
   0xd   : > { %p2250_p4 = por %p2886_p1, %p44_p0  ;;  %p1580_p5 = scmp.ge.s32.totalorder %s2184_s18, 1 }
   0xe   : > { %p2255_p6 = por %p142_p3, %p44_p0  ;;  %p149_p7 = scmp.lt.s32.totalorder %s2184_s18, 3 }
   0xf   : > { %s2890_s21 = scalar_select %p2250_p4, 1, 0 }
  0x10   : > { %s2891_s22 = scalar_select %p2255_p6, 1, 0 }
  0x11   : > { %p2260_p8 = pnand %p1580_p5, %p149_p7  ;;  %s2186_s24 = smov [#allocation7]  }
  0x12   : > { %s161_s25 = sshll.u32 %s2186_s24, 4  ;;  %s2187_s27 = smov [#allocation8]   ;;  %s162_s25 = int_to_ptr.vmem [resolvable:$true] %s161_s25 }
  0x13   : > { %p1842_p9 = pneg %p2260_p8  ;;  %s174_s28 = sshll.u32 %s2187_s27, 4  ;;  %s175_s28 = int_to_ptr.vmem [resolvable:$true] %s174_s28 }
  0x14   : > { %s2011_s29 = scalar_lea.vmem %s162_s25, 1024  ;;  %p2019_p5 = scmp.lt.s32.totalorder %s162_s25, %s162_s25 }
  0x15   : > { %p2269_p11 = pnand %p1842_p9, %p2886_p1  ;;  %p2012_p13 = scmp.ne.s32.totalorder %s162_s25, %s2011_s29 }
  0x16   : > { %p2020_p7 = scmp.lt.s32.totalorder %s2011_s29, %s2011_s29 }
  0x17   : > { %p2002_p12 = pneg %p2269_p11 }
  0x18   : > { %p2021_p10 = por %p2020_p7, %p2019_p5 }
  0x19   : > { %p2014_p0 = pnand %p2012_p13, %p2002_p12 }
  0x1b   : > { %p2015_p3 = pneg %p2014_p0 }
  0x1d   : > { %p2022_p9 = pnand %p2021_p10, %p2015_p3 }
  0x1f   : > { %2025 = shalt.err (!%p2022_p9)
}
  0x20   : > { %s2882_s30 = smov 64   ;;  %s2884_s5 = smov 4  }
  0x21   : > { %1845 = dma.hbm_to_vmem [thread:$0]  (!%p2269_p11), %s2879_s2, 1024, %s162_s25, [#allocation6], %s2882_s30, %s2882_s30, %s2884_s5  }
  0x22   : > { %s2037_s8 = scalar_lea.vmem %s175_s28, 1024  ;;  %p2045_p10 = scmp.lt.s32.totalorder %s175_s28, %s175_s28 }
  0x23   : > { %p2038_p13 = scmp.ne.s32.totalorder %s175_s28, %s2037_s8  ;;  %p2046_p3 = scmp.lt.s32.totalorder %s2037_s8, %s2037_s8 }
  0x25   : > { %p2040_p0 = pnand %p2038_p13, %p2002_p12  ;;  %p2047_p7 = por %p2046_p3, %p2045_p10 }
  0x27   : > { %p2041_p5 = pneg %p2040_p0 }
  0x29   : > { %p2048_p9 = pnand %p2047_p7, %p2041_p5 }
  0x2b   : > { %2051 = shalt.err (!%p2048_p9)
}
  0x2c   : > { %1848 = dma.hbm_to_vmem [thread:$0]  (!%p2269_p11), %s2880_s3, 1024, %s175_s28, [#allocation9], %s2882_s30, %s2882_s30, %s2884_s5  }
  0x2d   : > { %s2298_s11 = sadd.s32 1, %s2184_s18   ;;  %s31_s12 = sadd.s32 1, %s2180_s17 }
  0x2e   : > { %s28_s13 = ssub.s32 %s2184_s18, %s2298_s11  ;;  %p38_p12 = scmp.ne.s32.totalorder %s2180_s17, %s2176_s16 }
  0x2f   : > { %p29_p13 = scmp.eq.s32.totalorder %s28_s13, 0  ;;  %p39_p0 = scmp.eq.s32.totalorder %s2184_s18, 0 }
  0x30   : > { %p2308_p5 = por %p136_p2, %p38_p12  ;;  %p1862_p10 = scmp.lt.s32.totalorder %s2184_s18, 2 }
  0x31   : > { %s2314_s20 = scalar_select %p29_p13, %s2180_s17, %s31_s12  }
  0x32   : > { %s2894_s14 = scalar_select %p2308_p5, 1, 0 }
  0x33   : > { %p40_p3 = por %p39_p0, %p38_p12  ;;  %s188_s24 = sand.u32 1, %s2180_s17  }
  0x34   : > { %s1584_s25 = sshll.u32 %s188_s24, 6  ;;  %s1633_s26 = sshll.u32 %s2184_s18, 10 }
  0x35   : > { %s2895_s0 = sld [smem:[#allocation16_spill]]  ;;  %s192_s6 = scalar_lea.vmem [#allocation2], %s1584_s25 }
  0x36   : > { %s199_s7 = sshll.u32 %s192_s6, 4  ;;  %p2325_p2 = pnand %p1862_p10, %p40_p3  ;;  %s2323_s7 = int_to_ptr.vmem [resolvable:$true] %s199_s7 }
  0x37   : > { %s2332_s12 = scalar_lea.hbm %s2878_s1, %s1633_s26  ;;  %s213_s13 = scalar_lea.vmem [#allocation5], %s1584_s25 }
  0x38   : > { %s2334_s27 = sshll.u32 %s213_s13, 4  ;;  %s2336_s28 = scalar_lea.sflag [#allocation3], %s188_s24  ;;  %s2367_s27 = int_to_ptr.vmem [resolvable:$true] %s2334_s27 }
  0x39   : > { %p2054_p7 = pneg %p2325_p2 }
  0x3b   : > { %s2321_s29 = scalar_lea.hbm %s2895_s0, %s1633_s26  ;;  %s2057_s9 = scalar_lea.hbm %s2895_s0, 2048 }
  0x3c   : > { %s2052_s30 = scalar_lea.hbm %s2321_s29, 1024  ;;  %p2058_p13 = scmp.lt.s32.totalorder %s2321_s29, %s2895_s0 }
  0x3d   : > { %p2053_p11 = scmp.ne.s32.totalorder %s2321_s29, %s2052_s30  ;;  %p2059_p0 = scmp.lt.s32.totalorder %s2057_s9, %s2052_s30 }
  0x3f   : > { %p2055_p9 = pnand %p2054_p7, %p2053_p11  ;;  %p2060_p10 = por %p2059_p0, %p2058_p13 }
  0x41   : > { %p2056_p12 = pneg %p2055_p9 }
  0x43   : > { %p2061_p3 = pnand %p2060_p10, %p2056_p12 }
  0x45   : > { %2064 = shalt.err (!%p2061_p3)
}
  0x46   : > { %s2065_s24 = scalar_lea.vmem %s2323_s7, 1024  ;;  %s2190_s5 = smov [#allocation2]  }
  0x47   : > { %p2066_p1 = scmp.ne.s32.totalorder %s2323_s7, %s2065_s24  ;;  %s2070_s25 = sshll.u32 %s2190_s5, 4  ;;  %s2071_s25 = int_to_ptr.vmem [resolvable:$false] %s2070_s25 }
  0x48   : > { %s2072_s13 = scalar_lea.vmem %s2071_s25, 2048  ;;  %p2073_p6 = scmp.lt.s32.totalorder %s2323_s7, %s2071_s25 }
  0x49   : > { %p2068_p11 = pnand %p2066_p1, %p2054_p7  ;;  %p2074_p5 = scmp.lt.s32.totalorder %s2072_s13, %s2065_s24 }
  0x4b   : > { %p2069_p9 = pneg %p2068_p11  ;;  %p2075_p4 = por %p2074_p5, %p2073_p6 }
  0x4d   : > { %p2076_p13 = pnand %p2075_p4, %p2069_p9 }
  0x4f   : > { %2079 = shalt.err (!%p2076_p13)
}
  0x50   : > { %s2897_s30 = smov 4   ;;  %s2898_s6 = smov 64  }
  0x51   : > { %1852 = dma.hbm_to_vmem [thread:$0]  (!%p2325_p2), %s2321_s29, 1024, %s2323_s7, %s2336_s28, %s2898_s6, %s2898_s6, %s2897_s30  }
  0x52   : > { %s209_s9 = sand.u32 1, %s2184_s18   ;;  %s2080_s26 = scalar_lea.hbm %s2332_s12, 1024 }
  0x53   : > { %s210_s10 = scalar_lea.sflag [#allocation6], %s209_s9  ;;  %p2081_p1 = scmp.ne.s32.totalorder %s2332_s12, %s2080_s26 }
  0x54   : > { %s2085_s25 = scalar_lea.hbm %s2878_s1, 2048  ;;  %p2086_p5 = scmp.lt.s32.totalorder %s2332_s12, %s2878_s1 }
  0x55   : > { %p2083_p4 = pnand %p2081_p1, %p2054_p7  ;;  %p2087_p12 = scmp.lt.s32.totalorder %s2085_s25, %s2080_s26 }
  0x57   : > { %p2084_p6 = pneg %p2083_p4  ;;  %p2088_p0 = por %p2087_p12, %p2086_p5 }
  0x59   : > { %p2089_p10 = pnand %p2088_p0, %p2084_p6 }
  0x5b   : > { %2092 = shalt.err (!%p2089_p10)
}
  0x5c   : > { %s2093_s29 = scalar_lea.vmem %s2367_s27, 1024  ;;  %s2191_s7 = smov [#allocation5]  }
  0x5d   : > { %p2094_p3 = scmp.ne.s32.totalorder %s2367_s27, %s2093_s29  ;;  %s2098_s28 = sshll.u32 %s2191_s7, 4  ;;  %s2099_s28 = int_to_ptr.vmem [resolvable:$false] %s2098_s28 }
  0x5e   : > { %s2100_s9 = scalar_lea.vmem %s2099_s28, 2048  ;;  %p2101_p13 = scmp.lt.s32.totalorder %s2367_s27, %s2099_s28 }
  0x5f   : > { %p2096_p11 = pnand %p2094_p3, %p2054_p7  ;;  %p2102_p1 = scmp.lt.s32.totalorder %s2100_s9, %s2093_s29 }
  0x61   : > { %p2097_p9 = pneg %p2096_p11  ;;  %p2103_p4 = por %p2102_p1, %p2101_p13 }
  0x63   : > { %p2104_p5 = pnand %p2103_p4, %p2097_p9 }
  0x65   : > { %2107 = shalt.err (!%p2104_p5)
}
  0x66   : > { %1855 = dma.hbm_to_vmem [thread:$0]  (!%p2325_p2), %s2332_s12, 1024, %s2367_s27, %s210_s10, %s2898_s6, %s2898_s6, %s2897_s30  }
  0x67   : > { %232 = sbr.rel (%p2260_p8) target bundleno = 1442 (0x5a2), region = 36  ;;  %s2398_s0 = sand.u32 (!%p2260_p8), 1, %s2176_s16  }
  0x68   : > { %s1591_s26 = sshll.u32 (!%p2260_p8), %s2398_s0, 6  ;;  %s235_s24 = scalar_lea.sflag (!%p2260_p8), [#allocation3], %s2398_s0 }
  0x69   : > { %s2402_s5 = scalar_lea.vmem (!%p2260_p8), [#allocation2], %s1591_s26  ;;  %p2899_p7 = scmp.ne.s32.totalorder (!%p2260_p8), %s2890_s21, 0 }
  0x6c   : > { %2151 = dma.done.wait (%p2899_p7), %s235_s24, 1024  }
  0x6d   : > { %2153 = vsyncadd (%p2899_p7), %s235_s24, 4294966272  ;;  %s243_s8 = sand.u32 1, %s2241_s19   ;;  %s2409_s12 = scalar_lea.vmem [#allocation5], %s1591_s26 }
  0x6e   : > { %s244_s23 = scalar_lea.sflag [#allocation6], %s243_s8 }
  0x6f   : > { %2155 = dma.done.wait (%p2899_p7), %s244_s23, 1024  }
  0x70   : > { %2157 = vsyncadd (%p2899_p7), %s244_s23, 4294966272  ;;  %p2900_p8 = scmp.eq.s32.totalorder %s2241_s19, 0 }
  0x72   : > { %2159 = dma.done.wait (%p2900_p8), [#allocation6], 1024   ;;  %p2901_p2 = pmov %p2900_p8 }
  0x74   : > { %2161 = vsyncadd (%p2901_p2), [#allocation6], 4294966272  ;;  %p2902_p6 = pmov %p2901_p2 }
  0x75   : > { %p2903_p12 = pmov %p2901_p2 }
  0x76   : > { %2163 = dma.done.wait (%p2902_p6), [#allocation9], 1024  }
  0x77   : > { %2165 = vsyncadd (%p2903_p12), [#allocation9], 4294966272  ;;  %v1904_v0 = vld [vmem:[%s2402_s5 + $0x38] sm:$0xff]   ;;  %v1905_v1 = vld [vmem:[%s2402_s5 + $0x30] sm:$0xff]   ;;  %s1595_s21 = sshll.u32 %s2398_s0, 7  ;;  %s1635_s30 = sshll.u32 %s2241_s19, 11 }
  0x78   : > { %1700 = vmatprep.subr.bf16.mxu0 %v1904_v0  ;;  %v1906_v2 = vld [vmem:[%s2402_s5 + $0x28] sm:$0xff]   ;;  %v1907_v3 = vld [vmem:[%s2402_s5 + $0x20] sm:$0xff]   ;;  %v1908_v5 = vld [vmem:[%s2402_s5 + $0x18] sm:$0xff]   ;;  %s2761_s27 = scalar_lea.vmem [#allocation10], %s1595_s21  ;;  %s2831_s13 = scalar_lea.hbm %s2881_s4, %s1635_s30 }
  0x79   : > { %1701 = vmatpush3.bf16.msra.mxu0 %v1904_v0  ;;  %v2428_v4 = vld [vmem:[%s2409_s12] sm:$0xff]   ;;  %v1909_v6 = vld [vmem:[%s2402_s5 + $0x10] sm:$0xff]   ;;  %v1920_v7 = vld [vmem:[#allocation7 + $0x38] sm:$0xff]   ;;  %s1464_s6 = sshll.u32 %s2761_s27, 4  ;;  %s1451_s29 = scalar_lea.sflag [#allocation4], %s2398_s0  ;;  %s2833_s6 = int_to_ptr.vmem [resolvable:$true] %s1464_s6 }
  0x7a   : > { %1702 = vmatprep.subr.bf16.mxu0 %v1905_v1  ;;  %1716 = vmatprep.mubr.bf16.mxu0 %v2428_v4  ;;  %v1921_v8 = vld [vmem:[#allocation7 + $0x30] sm:$0xff]   ;;  %v1910_v9 = vld [vmem:[%s2402_s5 + $0x8] sm:$0xff]   ;;  %v1911_v11 = vld [vmem:[%s2402_s5] sm:$0xff]   ;;  %s2108_s7 = scalar_lea.vmem %s2833_s6, 2048  ;;  %p2904_p10 = scmp.ne.s32.totalorder %s2894_s14, 0 }
  0x7b   : > { %1732 = vmatprep.subr.bf16.mxu1 %v1920_v7  ;;  %v1922_v10 = vld [vmem:[#allocation7 + $0x28] sm:$0xff]   ;;  %v1923_v12 = vld [vmem:[#allocation7 + $0x20] sm:$0xff]   ;;  %v1924_v13 = vld [vmem:[#allocation7 + $0x18] sm:$0xff]   ;;  %p2109_p0 = scmp.ne.s32.totalorder %s2833_s6, %s2108_s7  ;;  %s2192_s19 = smov [#allocation10]  }
  0x7c   : > { %1733 = vmatpush3.bf16.msra.mxu1 %v1920_v7  ;;  %v2436_v14 = vld [vmem:[%s2409_s12 + $0x8] sm:$0xff]   ;;  %v2439_v15 = vld [vmem:[%s2409_s12 + $0x10] sm:$0xff]   ;;  %v2444_v17 = vld [vmem:[%s2409_s12 + $0x18] sm:$0xff]   ;;  %s2112_s28 = sshll.u32 %s2192_s19, 4  ;;  %s2113_s28 = int_to_ptr.vmem [resolvable:$false] %s2112_s28 }
  0x7d   : > { %1703 = vmatpush3.bf16.msra.mxu0 %v1905_v1  ;;  %1734 = vmatprep.subr.bf16.mxu1 %v1921_v8  ;;  %v1925_v16 = vld [vmem:[#allocation7 + $0x10] sm:$0xff]   ;;  %v2447_v18 = vld [vmem:[%s2409_s12 + $0x20] sm:$0xff]   ;;  %v2452_v19 = vld [vmem:[%s2409_s12 + $0x28] sm:$0xff]   ;;  %p2110_p3 = pnand %p2109_p0, %p2904_p10  ;;  %s2114_s9 = scalar_lea.vmem %s2113_s28, 4096 }
  0x7e   : > { %1704 = vmatprep.subr.bf16.mxu0 %v1906_v2  ;;  %v2455_v20 = vld [vmem:[%s2409_s12 + $0x30] sm:$0xff]   ;;  %v2460_v21 = vld [vmem:[%s2409_s12 + $0x38] sm:$0xff]   ;;  %v1926_v22 = vld [vmem:[#allocation7 + $0x8] sm:$0xff]   ;;  %p2115_p9 = scmp.lt.s32.totalorder %s2833_s6, %s2113_s28  ;;  %p2116_p13 = scmp.lt.s32.totalorder %s2114_s9, %s2108_s7 }
  0x7f   : > { %v1927_v23 = vld [vmem:[#allocation7] sm:$0xff]   ;;  %v1928_v60 = vld [vmem:[#allocation8 + $0x38] sm:$0xff]   ;;  %v1929_v1 = vld [vmem:[#allocation8 + $0x30] sm:$0xff]   ;;  %p2111_p11 = pneg %p2110_p3 }
  0x80   : > { %1735 = vmatpush3.bf16.msra.mxu1 %v1921_v8  ;;  %p2117_p1 = por %p2116_p13, %p2115_p9 }
  0x81   : > { %1705 = vmatpush3.bf16.msra.mxu0 %v1906_v2  ;;  %1736 = vmatprep.subr.bf16.mxu1 %v1922_v10 }
  0x82   : > { %1706 = vmatprep.subr.bf16.mxu0 %v1907_v3  ;;  %p2118_p4 = pnand %p2117_p1, %p2111_p11 }
  0x84   : > { %1737 = vmatpush3.bf16.msra.mxu1 %v1922_v10 }
  0x85   : > { %1707 = vmatpush3.bf16.msra.mxu0 %v1907_v3  ;;  %1738 = vmatprep.subr.bf16.mxu1 %v1923_v12 }
  0x86   : > { %1708 = vmatprep.subr.bf16.mxu0 %v1908_v5 }
  0x88   : > { %1739 = vmatpush3.bf16.msra.mxu1 %v1923_v12 }
  0x89   : > { %1709 = vmatpush3.bf16.msra.mxu0 %v1908_v5  ;;  %1740 = vmatprep.subr.bf16.mxu1 %v1924_v13 }
  0x8a   : > { %1710 = vmatprep.subr.bf16.mxu0 %v1909_v6 }
  0x8c   : > { %1741 = vmatpush3.bf16.msra.mxu1 %v1924_v13  ;;  %v1933_v13 = vld [vmem:[#allocation8 + $0x10] sm:$0xff]  }
  0x8d   : > { %1711 = vmatpush3.bf16.msra.mxu0 %v1909_v6  ;;  %1742 = vmatprep.subr.bf16.mxu1 %v1925_v16  ;;  %v1931_v6 = vld [vmem:[#allocation8 + $0x20] sm:$0xff]  }
  0x8e   : > { %1712 = vmatprep.subr.bf16.mxu0 %v1910_v9 }
  0x90   : > { %1743 = vmatpush3.bf16.msra.mxu1 %v1925_v16 }
  0x91   : > { %1713 = vmatpush3.bf16.msra.mxu0 %v1910_v9  ;;  %1744 = vmatprep.subr.bf16.mxu1 %v1926_v22  ;;  %v1932_v9 = vld [vmem:[#allocation8 + $0x18] sm:$0xff]  }
  0x92   : > { %1714 = vmatprep.subr.bf16.mxu0 %v1911_v11 }
  0x94   : > { %1745 = vmatpush3.bf16.msra.mxu1 %v1926_v22 }
  0x95   : > { %1715 = vmatpush3.bf16.msra.mxu0 %v1911_v11  ;;  %1746 = vmatprep.subr.bf16.mxu1 %v1927_v23 }
  0x96   : > { %1764 = vmatprep.subr.bf16.mxu0 %v1928_v60 }
  0x98   : > { %1717 = vmatmul.mubr.bf16.vlgmr.msra.gmra.mxu0 %v2436_v14  ;;  %1747 = vmatpush3.bf16.msra.mxu1 %v1927_v23  ;;  %v1934_v23 = vld [vmem:[#allocation8 + $0x8] sm:$0xff]  }
  0x99   : > { %1720 = vmatprep.mubr.bf16.mxu0 %v2439_v15  ;;  %1765 = vmatpush3.bf16.msra.mxu0 %v1928_v60 }
  0x9a   : > { %1766 = vmatprep.subr.bf16.mxu0 %v1929_v1 }
  0x9d   : > { %1767 = vmatpush3.bf16.msra.mxu0 %v1929_v1 }
  0xa0   : > { %1721 = vmatmul.mubr.bf16.gmra.mxu0 %v2444_v17 }
  0xa1   : > { %1724 = vmatprep.mubr.bf16.mxu0 %v2447_v18 }
  0xa8   : > { %1725 = vmatmul.mubr.bf16.gmra.mxu0 %v2452_v19 }
  0xa9   : > { %1728 = vmatprep.mubr.bf16.mxu0 %v2455_v20 }
  0xb0   : > { %1729 = vmatmul.mubr.bf16.gmra.mxu0 %v2460_v21 }
 0x158   : > { %v1718_v24 = vpop.f32.mrf.mxu0 }
 0x15a   : > { %v464_v25 = vpop.f32.mrf.mxu0 }
 0x15c   : > { %v1719_v26 = vpop.f32.mrf.mxu0 }
 0x15d   : > { %v528_v29 = vpack.c.bf16 %v1719_v26, %v1718_v24 }
 0x15e   : > { %v467_v27 = vpop.f32.mrf.mxu0 }
 0x15f   : > { %v527_v28 = vpack.c.bf16 %v467_v27, %v464_v25  ;;  %v1935_v25 = vld [vmem:[#allocation8] sm:$0xff]  }
 0x160   : > { %v1722_v30 = vpop.f32.mrf.mxu0 }
 0x161   : > { %1748 = vmatprep.mubr.bf16.mxu1 %v527_v28 }
 0x162   : > { %v480_v31 = vpop.f32.mrf.mxu0  ;;  %1749 = vmatmul.mubr.bf16.vlgmr.msra.gmra.mxu1 %v528_v29 }
 0x164   : > { %v1723_v32 = vpop.f32.mrf.mxu0 }
 0x165   : > { %v530_v33 = vpack.c.bf16 %v1723_v32, %v1722_v30 }
 0x166   : > { %v483_v34 = vpop.f32.mrf.mxu0 }
 0x167   : > { %v529_v35 = vpack.c.bf16 %v483_v34, %v480_v31 }
 0x168   : > { %v1726_v36 = vpop.f32.mrf.mxu0 }
 0x169   : > { %1752 = vmatprep.mubr.bf16.mxu1 %v529_v35 }
 0x16a   : > { %1753 = vmatmul.mubr.bf16.gmra.mxu1 %v530_v33  ;;  %v496_v37 = vpop.f32.mrf.mxu0 }
 0x16c   : > { %v1727_v38 = vpop.f32.mrf.mxu0 }
 0x16d   : > { %v532_v39 = vpack.c.bf16 %v1727_v38, %v1726_v36 }
 0x16e   : > { %v499_v40 = vpop.f32.mrf.mxu0 }
 0x16f   : > { %v531_v41 = vpack.c.bf16 %v499_v40, %v496_v37 }
 0x170   : > { %v1730_v42 = vpop.f32.mrf.mxu0 }
 0x171   : > { %1756 = vmatprep.mubr.bf16.mxu1 %v531_v41 }
 0x172   : > { %1757 = vmatmul.mubr.bf16.gmra.mxu1 %v532_v39  ;;  %v512_v43 = vpop.f32.mrf.mxu0 }
 0x174   : > { %v1731_v44 = vpop.f32.mrf.mxu0 }
 0x175   : > { %v534_v45 = vpack.c.bf16 %v1731_v44, %v1730_v42 }
 0x176   : > { %v515_v46 = vpop.f32.mrf.mxu0 }
 0x177   : > { %v533_v47 = vpack.c.bf16 %v515_v46, %v512_v43 }
 0x179   : > { %1760 = vmatprep.mubr.bf16.mxu1 %v533_v47 }
 0x17a   : > { %1761 = vmatmul.mubr.bf16.gmra.mxu1 %v534_v45 }
 0x17b   : > { %1812 = vmatprep.mubr.bf16.mxu1 %v2428_v4  ;;  %v1930_v4 = vld [vmem:[#allocation8 + $0x28] sm:$0xff]  }
 0x17c   : > { %1768 = vmatprep.subr.bf16.mxu0 %v1930_v4 }
 0x17d   : > { %1769 = vmatpush3.bf16.msra.mxu0 %v1930_v4 }
 0x17e   : > { %1770 = vmatprep.subr.bf16.mxu0 %v1931_v6 }
 0x181   : > { %1771 = vmatpush3.bf16.msra.mxu0 %v1931_v6 }
 0x182   : > { %1772 = vmatprep.subr.bf16.mxu0 %v1932_v9 }
 0x185   : > { %1773 = vmatpush3.bf16.msra.mxu0 %v1932_v9 }
 0x186   : > { %1774 = vmatprep.subr.bf16.mxu0 %v1933_v13 }
 0x189   : > { %1775 = vmatpush3.bf16.msra.mxu0 %v1933_v13 }
 0x18a   : > { %1776 = vmatprep.subr.bf16.mxu0 %v1934_v23 }
 0x18d   : > { %1777 = vmatpush3.bf16.msra.mxu0 %v1934_v23 }
 0x18e   : > { %1778 = vmatprep.subr.bf16.mxu0 %v1935_v25 }
 0x191   : > { %1779 = vmatpush3.bf16.msra.mxu0 %v1935_v25 }
 0x222   : > { %v2464_v48 = vpop.f32.mrf.mxu1 }
 0x223   : > { %684 = vadd.xlane.f32.xlu1 %v2464_v48  ;;  %v730_v51 = vmul.f32 %v2464_v48, %v2464_v48 }
 0x224   : > { %v2467_v49 = vpop.f32.mrf.mxu1 }
 0x225   : > { %680 = vadd.xlane.f32.xlu0 %v2467_v49  ;;  %v728_v55 = vmul.f32 %v2467_v49, %v2467_v49 }
 0x226   : > { %v2470_v50 = vpop.f32.mrf.mxu1 }
 0x227   : > { %686 = vadd.xlane.f32.xlu1 %v2470_v50  ;;  %v731_v53 = vmul.f32 %v2470_v50, %v2470_v50 }
 0x228   : > { %v2475_v52 = vpop.f32.mrf.mxu1 }
 0x229   : > { %748 = vadd.xlane.f32.xlu0 %v730_v51  ;;  %v729_v56 = vmul.f32 %v2475_v52, %v2475_v52 }
 0x22a   : > { %v2479_v54 = vpop.f32.mrf.mxu1 }
 0x22b   : > { %750 = vadd.xlane.f32.xlu1 %v731_v53  ;;  %v734_v63 = vmul.f32 %v2479_v54, %v2479_v54 }
 0x22c   : > { %v2485_v57 = vpop.f32.mrf.mxu1 }
 0x22d   : > { %744 = vadd.xlane.f32.xlu0 %v728_v55  ;;  %v732_v3 = vmul.f32 %v2485_v57, %v2485_v57 }
 0x22e   : > { %v2488_v58 = vpop.f32.mrf.mxu1 }
 0x22f   : > { %746 = vadd.xlane.f32.xlu1 %v729_v56  ;;  %v735_v61 = vmul.f32 %v2488_v58, %v2488_v58 }
 0x230   : > { %v2492_v59 = vpop.f32.mrf.mxu1 }
 0x231   : > { %682 = vadd.xlane.f32.xlu0 %v2475_v52  ;;  %v733_v0 = vmul.f32 %v2492_v59, %v2492_v59 }
 0x232   : > { %v2498_v62 = vpop.f32.mrf.mxu1 }
 0x233   : > { %694 = vadd.xlane.f32.xlu1 %v2488_v58  ;;  %v738_v11 = vmul.f32 %v2498_v62, %v2498_v62 }
 0x234   : > { %v2504_v2 = vpop.f32.mrf.mxu1 }
 0x235   : > { %692 = vadd.xlane.f32.xlu0 %v2479_v54  ;;  %v736_v22 = vmul.f32 %v2504_v2, %v2504_v2 }
 0x236   : > { %v2508_v5 = vpop.f32.mrf.mxu1 }
 0x237   : > { %690 = vadd.xlane.f32.xlu1 %v2492_v59  ;;  %v739_v8 = vmul.f32 %v2508_v5, %v2508_v5 }
 0x238   : > { %v2512_v7 = vpop.f32.mrf.mxu1 }
 0x239   : > { %688 = vadd.xlane.f32.xlu0 %v2485_v57  ;;  %v737_v12 = vmul.f32 %v2512_v7, %v2512_v7 }
 0x23a   : > { %v2518_v10 = vpop.f32.mrf.mxu1 }
 0x23b   : > { %758 = vadd.xlane.f32.xlu1 %v735_v61  ;;  %v742_v30 = vmul.f32 %v2518_v10, %v2518_v10 }
 0x23c   : > { %v2524_v16 = vpop.f32.mrf.mxu1 }
 0x23d   : > { %756 = vadd.xlane.f32.xlu0 %v734_v63  ;;  %v740_v28 = vmul.f32 %v2524_v16, %v2524_v16 }
 0x23e   : > { %v2528_v24 = vpop.f32.mrf.mxu1 }
 0x23f   : > { %754 = vadd.xlane.f32.xlu1 %v733_v0  ;;  %v743_v29 = vmul.f32 %v2528_v24, %v2528_v24 }
 0x240   : > { %v2532_v26 = vpop.f32.mrf.mxu1 }
 0x241   : > { %752 = vadd.xlane.f32.xlu0 %v732_v3  ;;  %v741_v27 = vmul.f32 %v2532_v26, %v2532_v26 }
 0x243   : > { %702 = vadd.xlane.f32.xlu1 %v2508_v5 }
 0x245   : > { %700 = vadd.xlane.f32.xlu0 %v2498_v62 }
 0x247   : > { %698 = vadd.xlane.f32.xlu1 %v2512_v7 }
 0x249   : > { %696 = vadd.xlane.f32.xlu0 %v2504_v2 }
 0x24b   : > { %766 = vadd.xlane.f32.xlu1 %v739_v8 }
 0x24d   : > { %764 = vadd.xlane.f32.xlu0 %v738_v11 }
 0x24f   : > { %762 = vadd.xlane.f32.xlu1 %v737_v12 }
 0x251   : > { %760 = vadd.xlane.f32.xlu0 %v736_v22 }
 0x253   : > { %710 = vadd.xlane.f32.xlu1 %v2528_v24 }
 0x255   : > { %708 = vadd.xlane.f32.xlu0 %v2518_v10 }
 0x257   : > { %706 = vadd.xlane.f32.xlu1 %v2532_v26 }
 0x259   : > { %704 = vadd.xlane.f32.xlu0 %v2524_v16 }
 0x25b   : > { %770 = vadd.xlane.f32.xlu1 %v741_v27 }
 0x25d   : > { %768 = vadd.xlane.f32.xlu0 %v740_v28 }
 0x25f   : > { %774 = vadd.xlane.f32.xlu1 %v743_v29 }
 0x261   : > { %772 = vadd.xlane.f32.xlu0 %v742_v30 }
 0x2ac   : > { %v685_v31 = vpop.xlane.xlu1 %684 }
 0x2ad   : > { %v2544_v33 = vmul.f32 0.03125, %v685_v31 }
 0x2ae   : > { %v681_v32 = vpop.xlane.xlu0 %680 }
 0x2af   : > { %v2548_v37 = vmul.f32 0.03125, %v681_v32  ;;  %v794_v39 = vmul.f32 %v2544_v33, %v2544_v33 }
 0x2b0   : > { %v687_v34 = vpop.xlane.xlu1 %686 }
 0x2b1   : > { %v2546_v35 = vmul.f32 0.03125, %v687_v34  ;;  %v792_v45 = vmul.f32 %v2548_v37, %v2548_v37 }
 0x2b2   : > { %v749_v36 = vpop.xlane.xlu0 %748 }
 0x2b3   : > { %v778_v38 = vmul.f32 0.03125, %v749_v36  ;;  %v795_v41 = vmul.f32 %v2546_v35, %v2546_v35 }
 0x2b4   : > { %v751_v40 = vpop.xlane.xlu1 %750 }
 0x2b5   : > { %v779_v42 = vmul.f32 0.03125, %v751_v40  ;;  %v810_v43 = vsub.f32 %v778_v38, %v794_v39 }
 0x2b6   : > { %v745_v44 = vpop.xlane.xlu0 %744 }
 0x2b7   : > { %v811_v46 = vsub.f32 %v779_v42, %v795_v41  ;;  %v776_v47 = vmul.f32 0.03125, %v745_v44  ;;  %v826_v56 = vmax.f32 %v810_v43, 0.0 }
 0x2b8   : > { %v747_v51 = vpop.xlane.xlu1 %746 }
 0x2b9   : > { %v827_v53 = vmax.f32 %v811_v46, 0.0  ;;  %v808_v55 = vsub.f32 %v776_v47, %v792_v45  ;;  %v777_v4 = vmul.f32 0.03125, %v747_v51  ;;  %v858_v8 = vadd.f32 1e-05, %v826_v56 }
 0x2ba   : > { %v683_v60 = vpop.xlane.xlu0 %682 }
 0x2bb   : > { %v824_v61 = vmax.f32 %v808_v55, 0.0  ;;  %v2556_v63 = vmul.f32 0.03125, %v683_v60  ;;  %v859_v0 = vadd.f32 1e-05, %v827_v53 }
 0x2bc   : > { %v695_v1 = vpop.xlane.xlu1 %694 }
 0x2bd   : > { %v856_v3 = vadd.f32 1e-05, %v824_v61  ;;  %v793_v6 = vmul.f32 %v2556_v63, %v2556_v63  ;;  %1936 = vrsqrt.f32 %v859_v0  ;;  %v2560_v22 = vmul.f32 0.03125, %v695_v1 }
 0x2be   : > { %v693_v9 = vpop.xlane.xlu0 %692 }
 0x2bf   : > { %v809_v11 = vsub.f32 %v777_v4, %v793_v6  ;;  %1938 = vrsqrt.f32 %v856_v3  ;;  %v2562_v27 = vmul.f32 0.03125, %v693_v9  ;;  %v799_v29 = vmul.f32 %v2560_v22, %v2560_v22 }
 0x2c0   : > { %v691_v12 = vpop.xlane.xlu1 %690  ;;  %1940 = vrsqrt.f32 %v858_v8  ;;  %v843_v4 = vsub.f32 %v2470_v50, %v2546_v35  ;;  %v840_v9 = vsub.f32 %v2467_v49, %v2548_v37 }
 0x2c1   : > { %v825_v13 = vmax.f32 %v809_v11, 0.0  ;;  %v2566_v30 = vmul.f32 0.03125, %v691_v12  ;;  %v798_v34 = vmul.f32 %v2562_v27, %v2562_v27 }
 0x2c2   : > { %v689_v23 = vpop.xlane.xlu0 %688 }
 0x2c3   : > { %v857_v25 = vadd.f32 1e-05, %v825_v13  ;;  %v2570_v36 = vmul.f32 0.03125, %v689_v23  ;;  %v797_v41 = vmul.f32 %v2566_v30, %v2566_v30  ;;  %v842_v13 = vsub.f32 %v2464_v48, %v2544_v33 }
 0x2c4   : > { %v759_v28 = vpop.xlane.xlu1 %758 }
 0x2c5   : > { %1942 = vrsqrt.f32 %v857_v25  ;;  %v783_v31 = vmul.f32 0.03125, %v759_v28  ;;  %v796_v46 = vmul.f32 %v2570_v36, %v2570_v36 }
 0x2c6   : > { %v757_v32 = vpop.xlane.xlu0 %756 }
 0x2c7   : > { %v815_v38 = vsub.f32 %v783_v31, %v799_v29  ;;  %v782_v39 = vmul.f32 0.03125, %v757_v32  ;;  %v841_v29 = vsub.f32 %v2475_v52, %v2556_v63 }
 0x2c8   : > { %v755_v40 = vpop.xlane.xlu1 %754 }
 0x2c9   : > { %v831_v42 = vmax.f32 %v815_v38, 0.0  ;;  %v814_v43 = vsub.f32 %v782_v39, %v798_v34  ;;  %v781_v44 = vmul.f32 0.03125, %v755_v40 }
 0x2ca   : > { %v753_v45 = vpop.xlane.xlu0 %752  ;;  %v1937_v60 = vpop.eup %1936 }
 0x2cb   : > { %v830_v47 = vmax.f32 %v814_v43, 0.0  ;;  %v813_v51 = vsub.f32 %v781_v44, %v797_v41  ;;  %v780_v53 = vmul.f32 0.03125, %v753_v45  ;;  %v863_v55 = vadd.f32 1e-05, %v831_v42 }
 0x2cc   : > { %v703_v56 = vpop.xlane.xlu1 %702  ;;  %v1939_v3 = vpop.eup %1938  ;;  %v891_v28 = vmul.f32 %v1937_v60, %v843_v4 }
 0x2cd   : > { %v862_v61 = vadd.f32 1e-05, %v830_v47  ;;  %v829_v0 = vmax.f32 %v813_v51, 0.0  ;;  %v812_v1 = vsub.f32 %v780_v53, %v796_v46  ;;  %v1941_v8 = vpop.eup %1940  ;;  %v2582_v23 = vmul.f32 0.03125, %v703_v56 }
 0x2ce   : > { %v701_v6 = vpop.xlane.xlu0 %700  ;;  %v888_v35 = vmul.f32 %v1939_v3, %v840_v9  ;;  %v890_v37 = vmul.f32 %v1941_v8, %v842_v13  ;;  %v907_v38 = vmax.f32 %v891_v28, 0.0  ;;  %v846_v13 = vsub.f32 %v2479_v54, %v2562_v27 }
 0x2cf   : > { %1944 = vrsqrt.f32 %v862_v61  ;;  %v861_v11 = vadd.f32 1e-05, %v829_v0  ;;  %v828_v12 = vmax.f32 %v812_v1, 0.0  ;;  %v2586_v32 = vmul.f32 0.03125, %v701_v6 }
 0x2d0   : > { %1946 = vrsqrt.f32 %v863_v55  ;;  %v699_v25 = vpop.xlane.xlu1 %698  ;;  %v803_v48 = vmul.f32 %v2582_v23, %v2582_v23  ;;  %v904_v52 = vmax.f32 %v888_v35, 0.0  ;;  %v906_v43 = vmax.f32 %v890_v37, 0.0 }
 0x2d1   : > { %1948 = vrsqrt.f32 %v861_v11  ;;  %v860_v50 = vadd.f32 1e-05, %v828_v12  ;;  %v2590_v40 = vmul.f32 0.03125, %v699_v25  ;;  %v802_v63 = vmul.f32 %v2586_v32, %v2586_v32 }
 0x2d2   : > { %v1943_v31 = vpop.eup %1942  ;;  %v697_v49 = vpop.xlane.xlu0 %696  ;;  %v937_v53 = vpack.c.bf16 %v907_v38, %v906_v43  ;;  %v847_v35 = vsub.f32 %v2488_v58, %v2560_v22  ;;  %v844_v38 = vsub.f32 %v2485_v57, %v2570_v36 }
 0x2d3   : > { %v889_v34 = vmul.f32 %v1943_v31, %v841_v29  ;;  %1950 = vrsqrt.f32 %v860_v50  ;;  %v2594_v44 = vmul.f32 0.03125, %v697_v49  ;;  %v801_v55 = vmul.f32 %v2590_v40, %v2590_v40 }
 0x2d4   : > { %v767_v33 = vpop.xlane.xlu1 %766  ;;  %v845_v31 = vsub.f32 %v2492_v59, %v2566_v30 }
 0x2d5   : > { %v905_v39 = vmax.f32 %v889_v34, 0.0  ;;  %v787_v41 = vmul.f32 0.03125, %v767_v33  ;;  %v800_v1 = vmul.f32 %v2594_v44, %v2594_v44 }
 0x2d6   : > { %v765_v42 = vpop.xlane.xlu0 %764 }
 0x2d7   : > { %v819_v45 = vsub.f32 %v787_v41, %v803_v48  ;;  %v786_v46 = vmul.f32 0.03125, %v765_v42  ;;  %v936_v47 = vpack.c.bf16 %v905_v39, %v904_v52 }
 0x2d8   : > { %v763_v51 = vpop.xlane.xlu1 %762 }
 0x2d9   : > { %v835_v56 = vmax.f32 %v819_v45, 0.0  ;;  %v818_v60 = vsub.f32 %v786_v46, %v802_v63  ;;  %v785_v61 = vmul.f32 0.03125, %v763_v51  ;;  %1780 = vmatprep.mubr.bf16.mxu0 %v936_v47 }
 0x2da   : > { %1781 = vmatmul.mubr.bf16.vlgmr.msra.gmra.mxu0 %v937_v53  ;;  %v761_v0 = vpop.xlane.xlu0 %760 }
 0x2db   : > { %v834_v3 = vmax.f32 %v818_v60, 0.0  ;;  %v817_v4 = vsub.f32 %v785_v61, %v801_v55  ;;  %v784_v6 = vmul.f32 0.03125, %v761_v0  ;;  %v867_v9 = vadd.f32 1e-05, %v835_v56 }
 0x2dc   : > { %v1945_v8 = vpop.eup %1944  ;;  %v711_v11 = vpop.xlane.xlu1 %710 }
 0x2dd   : > { %v1947_v12 = vpop.eup %1946  ;;  %v866_v25 = vadd.f32 1e-05, %v834_v3  ;;  %v833_v28 = vmax.f32 %v817_v4, 0.0  ;;  %v816_v29 = vsub.f32 %v784_v6, %v800_v1  ;;  %v894_v48 = vmul.f32 %v1945_v8, %v846_v13 }
 0x2de   : > { %v1949_v50 = vpop.eup %1948  ;;  %v709_v49 = vpop.xlane.xlu0 %708  ;;  %v895_v41 = vmul.f32 %v1947_v12, %v847_v35  ;;  %v2612_v45 = vmul.f32 0.03125, %v711_v11 }
 0x2df   : > { %1952 = vrsqrt.f32 %v866_v25  ;;  %v865_v37 = vadd.f32 1e-05, %v833_v28  ;;  %v832_v34 = vmax.f32 %v816_v29, 0.0  ;;  %v893_v27 = vmul.f32 %v1949_v50, %v845_v31 }
 0x2e0   : > { %v1951_v33 = vpop.eup %1950  ;;  %1954 = vrsqrt.f32 %v867_v9  ;;  %v707_v54 = vpop.xlane.xlu1 %706  ;;  %v910_v30 = vmax.f32 %v894_v48, 0.0  ;;  %v911_v46 = vmax.f32 %v895_v41, 0.0  ;;  %v2616_v47 = vmul.f32 0.03125, %v709_v49 }
 0x2e1   : > { %1956 = vrsqrt.f32 %v865_v37  ;;  %v864_v39 = vadd.f32 1e-05, %v832_v34  ;;  %v2608_v52 = vmul.f32 0.03125, %v707_v54  ;;  %v892_v22 = vmul.f32 %v1951_v33, %v844_v38 }
 0x2e2   : > { %v705_v58 = vpop.xlane.xlu0 %704  ;;  %v909_v43 = vmax.f32 %v893_v27, 0.0  ;;  %v939_v61 = vpack.c.bf16 %v911_v46, %v910_v30  ;;  %v807_v1 = vmul.f32 %v2612_v45, %v2612_v45  ;;  %v806_v8 = vmul.f32 %v2616_v47, %v2616_v47 }
 0x2e3   : > { %1958 = vrsqrt.f32 %v864_v39  ;;  %v2610_v59 = vmul.f32 0.03125, %v705_v58  ;;  %v908_v42 = vmax.f32 %v892_v22, 0.0  ;;  %v805_v57 = vmul.f32 %v2608_v52, %v2608_v52 }
 0x2e4   : > { %v771_v63 = vpop.xlane.xlu1 %770  ;;  %v850_v29 = vsub.f32 %v2498_v62, %v2586_v32  ;;  %v849_v50 = vsub.f32 %v2512_v7, %v2590_v40  ;;  %v851_v48 = vsub.f32 %v2508_v5, %v2582_v23  ;;  %v848_v33 = vsub.f32 %v2504_v2, %v2594_v44 }
 0x2e5   : > { %v789_v36 = vmul.f32 0.03125, %v771_v63  ;;  %v938_v53 = vpack.c.bf16 %v909_v43, %v908_v42  ;;  %v804_v55 = vmul.f32 %v2610_v59, %v2610_v59  ;;  %v853_v2 = vsub.f32 %v2532_v26, %v2608_v52 }
 0x2e6   : > { %v769_v51 = vpop.xlane.xlu0 %768  ;;  %v852_v44 = vsub.f32 %v2524_v16, %v2610_v59 }
 0x2e7   : > { %v821_v56 = vsub.f32 %v789_v36, %v805_v57  ;;  %v788_v60 = vmul.f32 0.03125, %v769_v51  ;;  %1784 = vmatprep.mubr.bf16.mxu0 %v938_v53  ;;  %v855_v57 = vsub.f32 %v2528_v24, %v2612_v45  ;;  %v854_v51 = vsub.f32 %v2518_v10, %v2616_v47 }
 0x2e8   : > { %v775_v0 = vpop.xlane.xlu1 %774  ;;  %1785 = vmatmul.mubr.bf16.gmra.mxu0 %v939_v61 }
 0x2e9   : > { %v837_v3 = vmax.f32 %v821_v56, 0.0  ;;  %v820_v4 = vsub.f32 %v788_v60, %v804_v55  ;;  %v791_v6 = vmul.f32 0.03125, %v775_v0 }
 0x2ea   : > { %v773_v9 = vpop.xlane.xlu0 %772 }
 0x2eb   : > { %v869_v11 = vadd.f32 1e-05, %v837_v3  ;;  %v836_v12 = vmax.f32 %v820_v4, 0.0  ;;  %v823_v13 = vsub.f32 %v791_v6, %v807_v1  ;;  %v790_v25 = vmul.f32 0.03125, %v773_v9 }
 0x2ec   : > { %v1953_v28 = vpop.eup %1952 }
 0x2ed   : > { %v1955_v35 = vpop.eup %1954  ;;  %1960 = vrsqrt.f32 %v869_v11  ;;  %v868_v31 = vadd.f32 1e-05, %v836_v12  ;;  %v839_v49 = vmax.f32 %v823_v13, 0.0  ;;  %v822_v37 = vsub.f32 %v790_v25, %v806_v8 }
 0x2ee   : > { %v1957_v34 = vpop.eup %1956  ;;  %v898_v38 = vmul.f32 %v1953_v28, %v850_v29  ;;  %v899_v39 = vmul.f32 %v1955_v35, %v851_v48 }
 0x2ef   : > { %1962 = vrsqrt.f32 %v868_v31  ;;  %v871_v54 = vadd.f32 1e-05, %v839_v49  ;;  %v838_v27 = vmax.f32 %v822_v37, 0.0  ;;  %v897_v62 = vmul.f32 %v1957_v34, %v849_v50 }
 0x2f0   : > { %v1959_v32 = vpop.eup %1958  ;;  %v914_v41 = vmax.f32 %v898_v38, 0.0  ;;  %v915_v30 = vmax.f32 %v899_v39, 0.0 }
 0x2f1   : > { %1964 = vrsqrt.f32 %v871_v54  ;;  %v870_v7 = vadd.f32 1e-05, %v838_v27  ;;  %v896_v40 = vmul.f32 %v1959_v32, %v848_v33  ;;  %v913_v22 = vmax.f32 %v897_v62, 0.0 }
 0x2f2   : > { %v941_v5 = vpack.c.bf16 %v915_v30, %v914_v41 }
 0x2f3   : > { %1966 = vrsqrt.f32 %v870_v7  ;;  %v912_v58 = vmax.f32 %v896_v40, 0.0 }
 0x2f5   : > { %v940_v63 = vpack.c.bf16 %v913_v22, %v912_v58 }
 0x2f7   : > { %1788 = vmatprep.mubr.bf16.mxu0 %v940_v63 }
 0x2f8   : > { %1789 = vmatmul.mubr.bf16.gmra.mxu0 %v941_v5 }
 0x2fa   : > { %v1961_v23 = vpop.eup %1960 }
 0x2fb   : > { %v901_v42 = vmul.f32 %v1961_v23, %v853_v2 }
 0x2fc   : > { %v1963_v43 = vpop.eup %1962 }
 0x2fd   : > { %v900_v36 = vmul.f32 %v1963_v43, %v852_v44  ;;  %v917_v55 = vmax.f32 %v901_v42, 0.0 }
 0x2fe   : > { %v1965_v46 = vpop.eup %1964 }
 0x2ff   : > { %v916_v53 = vmax.f32 %v900_v36, 0.0  ;;  %v903_v56 = vmul.f32 %v1965_v46, %v855_v57 }
 0x300   : > { %v1967_v60 = vpop.eup %1966 }
 0x301   : > { %v942_v61 = vpack.c.bf16 %v917_v55, %v916_v53  ;;  %v902_v26 = vmul.f32 %v1967_v60, %v854_v51  ;;  %v919_v0 = vmax.f32 %v903_v56, 0.0 }
 0x303   : > { %1792 = vmatprep.mubr.bf16.mxu0 %v942_v61  ;;  %v918_v52 = vmax.f32 %v902_v26, 0.0 }
 0x305   : > { %v943_v16 = vpack.c.bf16 %v919_v0, %v918_v52 }
 0x307   : > { %1793 = vmatmul.mubr.bf16.gmra.mxu0 %v943_v16 }
 0x39a   : > { %v1782_v59 = vpop.f32.mrf.mxu0 }
 0x39c   : > { %v1026_v1 = vpop.f32.mrf.mxu0 }
 0x39e   : > { %v1783_v3 = vpop.f32.mrf.mxu0 }
 0x39f   : > { %v1090_v34 = vpack.c.bf16 %v1783_v3, %v1782_v59 }
 0x3a0   : > { %v1029_v24 = vpop.f32.mrf.mxu0 }
 0x3a1   : > { %v1089_v48 = vpack.c.bf16 %v1029_v24, %v1026_v1 }
 0x3a8   : > { %v1786_v45 = vpop.f32.mrf.mxu0 }
 0x3aa   : > { %v1042_v4 = vpop.f32.mrf.mxu0 }
 0x3ac   : > { %v1787_v6 = vpop.f32.mrf.mxu0 }
 0x3ad   : > { %v1092_v49 = vpack.c.bf16 %v1787_v6, %v1786_v45 }
 0x3ae   : > { %v1045_v8 = vpop.f32.mrf.mxu0 }
 0x3af   : > { %v1091_v37 = vpack.c.bf16 %v1045_v8, %v1042_v4 }
 0x3b8   : > { %v1790_v10 = vpop.f32.mrf.mxu0 }
 0x3ba   : > { %v1058_v47 = vpop.f32.mrf.mxu0 }
 0x3bc   : > { %v1791_v9 = vpop.f32.mrf.mxu0 }
 0x3bd   : > { %v1094_v35 = vpack.c.bf16 %v1791_v9, %v1790_v10 }
 0x3be   : > { %v1061_v11 = vpop.f32.mrf.mxu0 }
 0x3bf   : > { %v1093_v31 = vpack.c.bf16 %v1061_v11, %v1058_v47 }
 0x3c7   : > { %v1794_v12 = vpop.f32.mrf.mxu0 }
 0x3c9   : > { %v1074_v13 = vpop.f32.mrf.mxu0 }
 0x3cb   : > { %v1795_v25 = vpop.f32.mrf.mxu0 }
 0x3cc   : > { %v1096_v28 = vpack.c.bf16 %v1795_v25, %v1794_v12 }
 0x3cd   : > { %v1077_v29 = vpop.f32.mrf.mxu0 }
 0x3ce   : > { %v1095_v50 = vpack.c.bf16 %v1077_v29, %v1074_v13  ;;  %1796 = vmatprep.subr.bf16.mxu1 %v1096_v28 }
 0x3cf   : > { %1797 = vmatpush3.bf16.msra.mxu1 %v1096_v28 }
 0x3d0   : > { %1798 = vmatprep.subr.bf16.mxu1 %v1095_v50 }
 0x3d3   : > { %1799 = vmatpush3.bf16.msra.mxu1 %v1095_v50 }
 0x3d4   : > { %1800 = vmatprep.subr.bf16.mxu1 %v1094_v35 }
 0x3d7   : > { %1801 = vmatpush3.bf16.msra.mxu1 %v1094_v35 }
 0x3d8   : > { %1802 = vmatprep.subr.bf16.mxu1 %v1093_v31 }
 0x3db   : > { %1803 = vmatpush3.bf16.msra.mxu1 %v1093_v31 }
 0x3dc   : > { %1804 = vmatprep.subr.bf16.mxu1 %v1092_v49 }
 0x3df   : > { %1805 = vmatpush3.bf16.msra.mxu1 %v1092_v49 }
 0x3e0   : > { %1806 = vmatprep.subr.bf16.mxu1 %v1091_v37 }
 0x3e3   : > { %1807 = vmatpush3.bf16.msra.mxu1 %v1091_v37 }
 0x3e4   : > { %1808 = vmatprep.subr.bf16.mxu1 %v1090_v34 }
 0x3e7   : > { %1809 = vmatpush3.bf16.msra.mxu1 %v1090_v34 }
 0x3e8   : > { %1810 = vmatprep.subr.bf16.mxu1 %v1089_v48 }
 0x3eb   : > { %1811 = vmatpush3.bf16.msra.mxu1 %v1089_v48 }
 0x3ee   : > { %1813 = vmatmul.mubr.bf16.vlgmr.msra.gmra.mxu1 %v2436_v14 }
 0x3ef   : > { %1816 = vmatprep.mubr.bf16.mxu1 %v2439_v15 }
 0x3f6   : > { %1817 = vmatmul.mubr.bf16.gmra.mxu1 %v2444_v17 }
 0x3f7   : > { %1820 = vmatprep.mubr.bf16.mxu1 %v2447_v18 }
 0x3fe   : > { %1821 = vmatmul.mubr.bf16.gmra.mxu1 %v2452_v19 }
 0x3ff   : > { %1824 = vmatprep.mubr.bf16.mxu1 %v2455_v20 }
 0x406   : > { %1825 = vmatmul.mubr.bf16.gmra.mxu1 %v2460_v21 }
 0x4ae   : > { %v2647_v33 = vpop.f32.mrf.mxu1 }
 0x4af   : > { %1198 = vadd.xlane.f32.xlu0 %v2647_v33  ;;  %v1244_v14 = vmul.f32 %v2647_v33, %v2647_v33 }
 0x4b0   : > { %v2650_v38 = vpop.f32.mrf.mxu1 }
 0x4b1   : > { %v1242_v17 = vmul.f32 %v2650_v38, %v2650_v38 }
 0x4b2   : > { %v2652_v54 = vpop.f32.mrf.mxu1 }
 0x4b3   : > { %1194 = vadd.xlane.f32.xlu0 %v2650_v38  ;;  %1200 = vadd.xlane.f32.xlu1 %v2652_v54  ;;  %v1245_v18 = vmul.f32 %v2652_v54, %v2652_v54 }
 0x4b4   : > { %v2658_v15 = vpop.f32.mrf.mxu1 }
 0x4b5   : > { %v1243_v20 = vmul.f32 %v2658_v15, %v2658_v15 }
 0x4b6   : > { %v2665_v19 = vpop.f32.mrf.mxu1 }
 0x4b7   : > { %1262 = vadd.xlane.f32.xlu0 %v1244_v14  ;;  %1196 = vadd.xlane.f32.xlu1 %v2658_v15  ;;  %v1248_v62 = vmul.f32 %v2665_v19, %v2665_v19 }
 0x4b8   : > { %v2669_v21 = vpop.f32.mrf.mxu1 }
 0x4b9   : > { %v1246_v39 = vmul.f32 %v2669_v21, %v2669_v21 }
 0x4ba   : > { %v2672_v27 = vpop.f32.mrf.mxu1 }
 0x4bb   : > { %1258 = vadd.xlane.f32.xlu0 %v1242_v17  ;;  %1264 = vadd.xlane.f32.xlu1 %v1245_v18  ;;  %v1249_v7 = vmul.f32 %v2672_v27, %v2672_v27 }
 0x4bc   : > { %v2678_v32 = vpop.f32.mrf.mxu1 }
 0x4bd   : > { %v1247_v41 = vmul.f32 %v2678_v32, %v2678_v32 }
 0x4be   : > { %v2685_v40 = vpop.f32.mrf.mxu1 }
 0x4bf   : > { %1260 = vadd.xlane.f32.xlu1 %v1243_v20  ;;  %1206 = vadd.xlane.f32.xlu0 %v2665_v19  ;;  %v1252_v30 = vmul.f32 %v2685_v40, %v2685_v40 }
 0x4c0   : > { %v2689_v58 = vpop.f32.mrf.mxu1 }
 0x4c1   : > { %v1250_v5 = vmul.f32 %v2689_v58, %v2689_v58 }
 0x4c2   : > { %v2692_v22 = vpop.f32.mrf.mxu1 }
 0x4c3   : > { %1202 = vadd.xlane.f32.xlu0 %v2669_v21  ;;  %1208 = vadd.xlane.f32.xlu1 %v2672_v27  ;;  %v1253_v2 = vmul.f32 %v2692_v22, %v2692_v22 }
 0x4c4   : > { %v2698_v63 = vpop.f32.mrf.mxu1 }
 0x4c5   : > { %v1251_v44 = vmul.f32 %v2698_v63, %v2698_v63 }
 0x4c6   : > { %v2705_v23 = vpop.f32.mrf.mxu1 }
 0x4c7   : > { %1270 = vadd.xlane.f32.xlu0 %v1248_v62  ;;  %1204 = vadd.xlane.f32.xlu1 %v2678_v32  ;;  %v1256_v46 = vmul.f32 %v2705_v23, %v2705_v23 }
 0x4c8   : > { %v2709_v42 = vpop.f32.mrf.mxu1 }
 0x4c9   : > { %v1254_v57 = vmul.f32 %v2709_v42, %v2709_v42 }
 0x4ca   : > { %v2712_v43 = vpop.f32.mrf.mxu1 }
 0x4cb   : > { %1266 = vadd.xlane.f32.xlu0 %v1246_v39  ;;  %1272 = vadd.xlane.f32.xlu1 %v1249_v7  ;;  %v1257_v53 = vmul.f32 %v2712_v43, %v2712_v43 }
 0x4cc   : > { %v2718_v36 = vpop.f32.mrf.mxu1 }
 0x4cd   : > { %v1255_v51 = vmul.f32 %v2718_v36, %v2718_v36 }
 0x4cf   : > { %1268 = vadd.xlane.f32.xlu1 %v1247_v41  ;;  %1214 = vadd.xlane.f32.xlu0 %v2685_v40 }
 0x4d3   : > { %1210 = vadd.xlane.f32.xlu0 %v2689_v58  ;;  %1216 = vadd.xlane.f32.xlu1 %v2692_v22 }
 0x4d7   : > { %1278 = vadd.xlane.f32.xlu0 %v1252_v30  ;;  %1212 = vadd.xlane.f32.xlu1 %v2698_v63 }
 0x4db   : > { %1274 = vadd.xlane.f32.xlu0 %v1250_v5  ;;  %1280 = vadd.xlane.f32.xlu1 %v1253_v2 }
 0x4df   : > { %1276 = vadd.xlane.f32.xlu1 %v1251_v44  ;;  %1222 = vadd.xlane.f32.xlu0 %v2705_v23 }
 0x4e3   : > { %1218 = vadd.xlane.f32.xlu0 %v2709_v42  ;;  %1224 = vadd.xlane.f32.xlu1 %v2712_v43 }
 0x4e7   : > { %1282 = vadd.xlane.f32.xlu0 %v1254_v57  ;;  %1220 = vadd.xlane.f32.xlu1 %v2718_v36 }
 0x4eb   : > { %1286 = vadd.xlane.f32.xlu0 %v1256_v46  ;;  %1284 = vadd.xlane.f32.xlu1 %v1255_v51 }
 0x4ef   : > { %1288 = vadd.xlane.f32.xlu1 %v1257_v53 }
 0x538   : > { %v1199_v55 = vpop.xlane.xlu0 %1198 }
 0x539   : > { %v1228_v61 = vmul.f32 0.125, %v1199_v55 }
 0x53b   : > { %v1308_v16 = vmul.f32 %v1228_v61, %v1228_v61  ;;  %v1356_v44 = vsub.f32 %v2647_v33, %v1228_v61 }
 0x53c   : > { %v1195_v56 = vpop.xlane.xlu0 %1194  ;;  %v1201_v60 = vpop.xlane.xlu1 %1200 }
 0x53d   : > { %v2727_v26 = vmul.f32 0.125, %v1195_v56  ;;  %v2729_v59 = vmul.f32 0.125, %v1201_v60 }
 0x53f   : > { %v1306_v24 = vmul.f32 %v2727_v26, %v2727_v26  ;;  %v1309_v8 = vmul.f32 %v2729_v59, %v2729_v59  ;;  %v1354_v33 = vsub.f32 %v2650_v38, %v2727_v26 }
 0x540   : > { %v1263_v52 = vpop.xlane.xlu0 %1262  ;;  %v1197_v0 = vpop.xlane.xlu1 %1196 }
 0x541   : > { %v1292_v1 = vmul.f32 0.125, %v1263_v52  ;;  %v2733_v45 = vmul.f32 0.125, %v1197_v0 }
 0x543   : > { %v1324_v3 = vsub.f32 %v1292_v1, %v1308_v16  ;;  %v1307_v25 = vmul.f32 %v2733_v45, %v2733_v45 }
 0x544   : > { %v1259_v4 = vpop.xlane.xlu0 %1258  ;;  %v1265_v6 = vpop.xlane.xlu1 %1264 }
 0x545   : > { %v1340_v10 = vmax.f32 %v1324_v3, 0.0  ;;  %v1290_v47 = vmul.f32 0.125, %v1259_v4  ;;  %v1293_v9 = vmul.f32 0.125, %v1265_v6 }
 0x547   : > { %v1372_v11 = vadd.f32 1e-05, %v1340_v10  ;;  %v1322_v12 = vsub.f32 %v1290_v47, %v1306_v24  ;;  %v1325_v13 = vsub.f32 %v1293_v9, %v1309_v8  ;;  %v1357_v9 = vsub.f32 %v2652_v54, %v2729_v59 }
 0x548   : > { %v1261_v28 = vpop.xlane.xlu1 %1260  ;;  %v1207_v29 = vpop.xlane.xlu0 %1206  ;;  %v1355_v54 = vsub.f32 %v2658_v15, %v2733_v45 }
 0x549   : > { %1968 = vrsqrt.f32 %v1372_v11  ;;  %v1338_v50 = vmax.f32 %v1322_v12, 0.0  ;;  %v1341_v35 = vmax.f32 %v1325_v13, 0.0  ;;  %v1291_v31 = vmul.f32 0.125, %v1261_v28 }
 0x54a   : > { %v2739_v18 = vmul.f32 0.125, %v1207_v29 }
 0x54b   : > { %v1370_v49 = vadd.f32 1e-05, %v1338_v50  ;;  %v1373_v37 = vadd.f32 1e-05, %v1341_v35  ;;  %v1323_v34 = vsub.f32 %v1291_v31, %v1307_v25 }
 0x54c   : > { %v1203_v48 = vpop.xlane.xlu0 %1202  ;;  %v1209_v14 = vpop.xlane.xlu1 %1208  ;;  %v1312_v41 = vmul.f32 %v2739_v18, %v2739_v18 }
 0x54d   : > { %1970 = vrsqrt.f32 %v1370_v49  ;;  %v1339_v17 = vmax.f32 %v1323_v34, 0.0  ;;  %v2741_v62 = vmul.f32 0.125, %v1203_v48  ;;  %v2745_v30 = vmul.f32 0.125, %v1209_v14 }
 0x54e   : > { %1972 = vrsqrt.f32 %v1373_v37 }
 0x54f   : > { %v1371_v20 = vadd.f32 1e-05, %v1339_v17  ;;  %v1310_v57 = vmul.f32 %v2741_v62, %v2741_v62  ;;  %v1313_v53 = vmul.f32 %v2745_v30, %v2745_v30 }
 0x550   : > { %v1271_v39 = vpop.xlane.xlu0 %1270  ;;  %v1205_v7 = vpop.xlane.xlu1 %1204 }
 0x551   : > { %1974 = vrsqrt.f32 %v1371_v20  ;;  %v1296_v5 = vmul.f32 0.125, %v1271_v39  ;;  %v2753_v0 = vmul.f32 0.125, %v1205_v7 }
 0x553   : > { %v1328_v2 = vsub.f32 %v1296_v5, %v1312_v41  ;;  %v1311_v11 = vmul.f32 %v2753_v0, %v2753_v0 }
 0x554   : > { %v1267_v46 = vpop.xlane.xlu0 %1266  ;;  %v1273_v51 = vpop.xlane.xlu1 %1272 }
 0x555   : > { %v1344_v55 = vmax.f32 %v1328_v2, 0.0  ;;  %v1294_v56 = vmul.f32 0.125, %v1267_v46  ;;  %v1297_v60 = vmul.f32 0.125, %v1273_v51  ;;  %v1360_v2 = vsub.f32 %v2665_v19, %v2739_v18 }
 0x556   : > { %v1969_v52 = vpop.eup %1968  ;;  %v1358_v19 = vsub.f32 %v2669_v21, %v2741_v62 }
 0x557   : > { %v1404_v16 = vmul.f32 %v1969_v52, %v1356_v44  ;;  %v1376_v1 = vadd.f32 1e-05, %v1344_v55  ;;  %v1326_v3 = vsub.f32 %v1294_v56, %v1310_v57  ;;  %v1329_v24 = vsub.f32 %v1297_v60, %v1313_v53 }
 0x558   : > { %v1269_v61 = vpop.xlane.xlu1 %1268  ;;  %v1215_v4 = vpop.xlane.xlu0 %1214 }
 0x559   : > { %v1420_v6 = vmax.f32 %v1404_v16, 0.0  ;;  %1976 = vrsqrt.f32 %v1376_v1  ;;  %v1342_v8 = vmax.f32 %v1326_v3, 0.0  ;;  %v1345_v10 = vmax.f32 %v1329_v24, 0.0 }
 0x55a   : > { %v1971_v47 = vpop.eup %1970  ;;  %v1295_v12 = vmul.f32 0.125, %v1269_v61  ;;  %v2766_v31 = vmul.f32 0.125, %v1215_v4 }
 0x55b   : > { %v1973_v13 = vpop.eup %1972  ;;  %1436 = vst [vmem:[%s2761_s27 + $0x10] sm:$0xff] %v1420_v6  ;;  %v1402_v38 = vmul.f32 %v1971_v47, %v1354_v33  ;;  %v1374_v26 = vadd.f32 1e-05, %v1342_v8  ;;  %v1377_v25 = vadd.f32 1e-05, %v1345_v10  ;;  %v1361_v10 = vsub.f32 %v2672_v27, %v2745_v30 }
 0x55c   : > { %v1405_v28 = vmul.f32 %v1973_v13, %v1357_v9  ;;  %v1327_v29 = vsub.f32 %v1295_v12, %v1311_v11  ;;  %v1211_v50 = vpop.xlane.xlu0 %1210  ;;  %v1217_v35 = vpop.xlane.xlu1 %1216  ;;  %v1316_v15 = vmul.f32 %v2766_v31, %v2766_v31  ;;  %v1359_v27 = vsub.f32 %v2678_v32, %v2753_v0 }
 0x55d   : > { %v1418_v59 = vmax.f32 %v1402_v38, 0.0  ;;  %1978 = vrsqrt.f32 %v1374_v26  ;;  %v2770_v17 = vmul.f32 0.125, %v1211_v50  ;;  %v2774_v45 = vmul.f32 0.125, %v1217_v35 }
 0x55e   : > { %v1975_v49 = vpop.eup %1974  ;;  %v1421_v37 = vmax.f32 %v1405_v28, 0.0  ;;  %1980 = vrsqrt.f32 %v1377_v25  ;;  %v1343_v34 = vmax.f32 %v1327_v29, 0.0  ;;  %v1364_v0 = vsub.f32 %v2685_v40, %v2766_v31 }
 0x55f   : > { %1434 = vst [vmem:[%s2761_s27] sm:$0xff] %v1418_v59  ;;  %v1403_v48 = vmul.f32 %v1975_v49, %v1355_v54  ;;  %v1314_v44 = vmul.f32 %v2770_v17, %v2770_v17  ;;  %v1317_v51 = vmul.f32 %v2774_v45, %v2774_v45 }
 0x560   : > { %1437 = vst [vmem:[%s2761_s27 + $0x18] sm:$0xff] %v1421_v37  ;;  %v1375_v14 = vadd.f32 1e-05, %v1343_v34  ;;  %v1279_v20 = vpop.xlane.xlu0 %1278  ;;  %v1213_v39 = vpop.xlane.xlu1 %1212 }
 0x561   : > { %v1419_v7 = vmax.f32 %v1403_v48, 0.0  ;;  %v1300_v41 = vmul.f32 0.125, %v1279_v20  ;;  %v2783_v52 = vmul.f32 0.125, %v1213_v39 }
 0x562   : > { %1982 = vrsqrt.f32 %v1375_v14 }
 0x563   : > { %1435 = vst [vmem:[%s2761_s27 + $0x8] sm:$0xff] %v1419_v7  ;;  %v1332_v5 = vsub.f32 %v1300_v41, %v1316_v15  ;;  %v1315_v47 = vmul.f32 %v2783_v52, %v2783_v52 }
 0x564   : > { %v1275_v57 = vpop.xlane.xlu0 %1274  ;;  %v1281_v46 = vpop.xlane.xlu1 %1280 }
 0x565   : > { %v1348_v53 = vmax.f32 %v1332_v5, 0.0  ;;  %v1298_v55 = vmul.f32 0.125, %v1275_v57  ;;  %v1301_v56 = vmul.f32 0.125, %v1281_v46 }
 0x566   : > { %v1977_v60 = vpop.eup %1976 }
 0x567   : > { %v1408_v16 = vmul.f32 %v1977_v60, %v1360_v2  ;;  %v1380_v1 = vadd.f32 1e-05, %v1348_v53  ;;  %v1330_v3 = vsub.f32 %v1298_v55, %v1314_v44  ;;  %v1333_v24 = vsub.f32 %v1301_v56, %v1317_v51 }
 0x568   : > { %v1277_v18 = vpop.xlane.xlu1 %1276  ;;  %v1223_v33 = vpop.xlane.xlu0 %1222 }
 0x569   : > { %v1424_v61 = vmax.f32 %v1408_v16, 0.0  ;;  %1984 = vrsqrt.f32 %v1380_v1  ;;  %v1346_v4 = vmax.f32 %v1330_v3, 0.0  ;;  %v1349_v6 = vmax.f32 %v1333_v24, 0.0 }
 0x56a   : > { %v1979_v8 = vpop.eup %1978  ;;  %v1299_v9 = vmul.f32 0.125, %v1277_v18  ;;  %v2798_v49 = vmul.f32 0.125, %v1223_v33  ;;  %v1362_v16 = vsub.f32 %v2689_v58, %v2770_v17 }
 0x56b   : > { %v1981_v11 = vpop.eup %1980  ;;  %1440 = vst [vmem:[%s2761_s27 + $0x30] sm:$0xff] %v1424_v61  ;;  %v1406_v12 = vmul.f32 %v1979_v8, %v1358_v19  ;;  %v1378_v21 = vadd.f32 1e-05, %v1346_v4  ;;  %v1381_v62 = vadd.f32 1e-05, %v1349_v6  ;;  %v1365_v19 = vsub.f32 %v2692_v22, %v2774_v45 }
 0x56c   : > { %v1409_v13 = vmul.f32 %v1981_v11, %v1361_v10  ;;  %v1331_v38 = vsub.f32 %v1299_v9, %v1315_v47  ;;  %v1219_v26 = vpop.xlane.xlu0 %1218  ;;  %v1225_v25 = vpop.xlane.xlu1 %1224  ;;  %v1320_v7 = vmul.f32 %v2798_v49, %v2798_v49  ;;  %v1363_v47 = vsub.f32 %v2698_v63, %v2783_v52 }
 0x56d   : > { %v1422_v28 = vmax.f32 %v1406_v12, 0.0  ;;  %1986 = vrsqrt.f32 %v1378_v21  ;;  %v2792_v29 = vmul.f32 0.125, %v1219_v26  ;;  %v1241_v51 = vmul.f32 0.125, %v1225_v25 }
 0x56e   : > { %v1425_v30 = vmax.f32 %v1409_v13, 0.0  ;;  %1988 = vrsqrt.f32 %v1381_v62  ;;  %v1347_v50 = vmax.f32 %v1331_v38, 0.0  ;;  %v1368_v52 = vsub.f32 %v2705_v23, %v2798_v49 }
 0x56f   : > { %v1983_v35 = vpop.eup %1982  ;;  %1438 = vst [vmem:[%s2761_s27 + $0x20] sm:$0xff] %v1422_v28  ;;  %v1318_v48 = vmul.f32 %v2792_v29, %v2792_v29  ;;  %v1321_v18 = vmul.f32 %v1241_v51, %v1241_v51  ;;  %v1366_v62 = vsub.f32 %v2709_v42, %v2792_v29  ;;  %v1369_v42 = vsub.f32 %v2712_v43, %v1241_v51 }
 0x570   : > { %1441 = vst [vmem:[%s2761_s27 + $0x38] sm:$0xff] %v1425_v30  ;;  %v1407_v54 = vmul.f32 %v1983_v35, %v1359_v27  ;;  %v1379_v59 = vadd.f32 1e-05, %v1347_v50  ;;  %v1283_v37 = vpop.xlane.xlu0 %1282  ;;  %v1221_v34 = vpop.xlane.xlu1 %1220 }
 0x571   : > { %v1302_v14 = vmul.f32 0.125, %v1283_v37  ;;  %v1239_v20 = vmul.f32 0.125, %v1221_v34 }
 0x572   : > { %v1423_v39 = vmax.f32 %v1407_v54, 0.0  ;;  %1990 = vrsqrt.f32 %v1379_v59 }
 0x573   : > { %v1334_v32 = vsub.f32 %v1302_v14, %v1318_v48  ;;  %v1319_v2 = vmul.f32 %v1239_v20, %v1239_v20  ;;  %v1367_v25 = vsub.f32 %v2718_v36, %v1239_v20 }
 0x574   : > { %1439 = vst [vmem:[%s2761_s27 + $0x28] sm:$0xff] %v1423_v39  ;;  %v1287_v15 = vpop.xlane.xlu0 %1286  ;;  %v1285_v41 = vpop.xlane.xlu1 %1284 }
 0x575   : > { %v1350_v5 = vmax.f32 %v1334_v32, 0.0  ;;  %v1304_v44 = vmul.f32 0.125, %v1287_v15  ;;  %v1303_v57 = vmul.f32 0.125, %v1285_v41 }
 0x576   : > { %v1985_v46 = vpop.eup %1984 }
 0x577   : > { %v1412_v53 = vmul.f32 %v1985_v46, %v1364_v0  ;;  %v1382_v55 = vadd.f32 1e-05, %v1350_v5  ;;  %v1336_v56 = vsub.f32 %v1304_v44, %v1320_v7  ;;  %v1335_v60 = vsub.f32 %v1303_v57, %v1319_v2 }
 0x578   : > { %v1289_v40 = vpop.xlane.xlu1 %1288 }
 0x579   : > { %v1428_v31 = vmax.f32 %v1412_v53, 0.0  ;;  %1992 = vrsqrt.f32 %v1382_v55  ;;  %v1352_v1 = vmax.f32 %v1336_v56, 0.0  ;;  %v1351_v3 = vmax.f32 %v1335_v60, 0.0 }
 0x57a   : > { %v1987_v24 = vpop.eup %1986  ;;  %v1305_v33 = vmul.f32 0.125, %v1289_v40 }
 0x57b   : > { %v1989_v61 = vpop.eup %1988  ;;  %1444 = vst [vmem:[%s2761_s27 + $0x50] sm:$0xff] %v1428_v31  ;;  %v1410_v4 = vmul.f32 %v1987_v24, %v1362_v16  ;;  %v1384_v6 = vadd.f32 1e-05, %v1352_v1  ;;  %v1383_v8 = vadd.f32 1e-05, %v1351_v3 }
 0x57c   : > { %v1413_v58 = vmul.f32 %v1989_v61, %v1365_v19  ;;  %v1337_v17 = vsub.f32 %v1305_v33, %v1321_v18 }
 0x57d   : > { %v1426_v10 = vmax.f32 %v1410_v4, 0.0  ;;  %1994 = vrsqrt.f32 %v1384_v6 }
 0x57e   : > { %v1429_v9 = vmax.f32 %v1413_v58, 0.0  ;;  %1996 = vrsqrt.f32 %v1383_v8  ;;  %v1353_v22 = vmax.f32 %v1337_v17, 0.0 }
 0x57f   : > { %v1991_v45 = vpop.eup %1990  ;;  %1442 = vst [vmem:[%s2761_s27 + $0x40] sm:$0xff] %v1426_v10 }
 0x580   : > { %1445 = vst [vmem:[%s2761_s27 + $0x58] sm:$0xff] %v1429_v9  ;;  %v1411_v11 = vmul.f32 %v1991_v45, %v1363_v47  ;;  %v1385_v12 = vadd.f32 1e-05, %v1353_v22 }
 0x582   : > { %v1427_v21 = vmax.f32 %v1411_v11, 0.0  ;;  %1998 = vrsqrt.f32 %v1385_v12 }
 0x584   : > { %1443 = vst [vmem:[%s2761_s27 + $0x48] sm:$0xff] %v1427_v21 }
 0x586   : > { %v1993_v13 = vpop.eup %1992 }
 0x587   : > { %v1414_v63 = vmul.f32 %v1993_v13, %v1366_v62 }
 0x589   : > { %v1430_v38 = vmax.f32 %v1414_v63, 0.0 }
 0x58a   : > { %v1995_v26 = vpop.eup %1994 }
 0x58b   : > { %v1997_v28 = vpop.eup %1996  ;;  %1446 = vst [vmem:[%s2761_s27 + $0x60] sm:$0xff] %v1430_v38  ;;  %v1416_v27 = vmul.f32 %v1995_v26, %v1368_v52 }
 0x58c   : > { %v1415_v30 = vmul.f32 %v1997_v28, %v1367_v25 }
 0x58d   : > { %v1432_v50 = vmax.f32 %v1416_v27, 0.0 }
 0x58e   : > { %v1431_v29 = vmax.f32 %v1415_v30, 0.0 }
 0x58f   : > { %v1999_v35 = vpop.eup %1998  ;;  %1448 = vst [vmem:[%s2761_s27 + $0x70] sm:$0xff] %v1432_v50 }
 0x590   : > { %1447 = vst [vmem:[%s2761_s27 + $0x68] sm:$0xff] %v1431_v29  ;;  %v1417_v23 = vmul.f32 %v1999_v35, %v1369_v42 }
 0x592   : > { %v1433_v36 = vmax.f32 %v1417_v23, 0.0 }
 0x594   : > { %1449 = vst [vmem:[%s2761_s27 + $0x78] sm:$0xff] %v1433_v36 }
 0x595   : > { %2121 = shalt.err (!%p2118_p4)
}
 0x596   : > { %s2122_s26 = scalar_lea.hbm %s2831_s13, 2048  ;;  %s2126_s8 = scalar_lea.hbm %s2881_s4, 4096 }
 0x597   : > { %p2123_p5 = scmp.ne.s32.totalorder %s2831_s13, %s2122_s26  ;;  %p2127_p2 = scmp.lt.s32.totalorder %s2831_s13, %s2881_s4 }
 0x598   : > { %p2128_p6 = scmp.lt.s32.totalorder %s2126_s8, %s2122_s26 }
 0x599   : > { %p2124_p7 = pnand %p2123_p5, %p2904_p10 }
 0x59a   : > { %p2129_p12 = por %p2128_p6, %p2127_p2 }
 0x59b   : > { %p2125_p8 = pneg %p2124_p7 }
 0x59d   : > { %p2130_p0 = pnand %p2129_p12, %p2125_p8 }
 0x59f   : > { %2133 = shalt.err (!%p2130_p0)
}
 0x5a0   : > { %s2193_s21 = smov 128   ;;  %s2194_s27 = smov 8  }
 0x5a1   : > { %1840 = dma.vmem_to_hbm [thread:$0]  (%p2904_p10), %s2833_s6, 2048, %s2831_s13, %s1451_s29, %s2193_s21, %s2193_s21, %s2194_s27  }
 0x5a2 PF: > { %s1479_s30 = sand.u32 1, %s2172_s15   ;;  %p2905_p3 = scmp.ne.s32.totalorder %s2891_s22, 0 }
 0x5a3   : > { %p2906_p11 = scmp.ge.s32.totalorder %s2184_s18, 2  ;;  %s1480_s10 = scalar_lea.sflag [#allocation4], %s1479_s30 }
 0x5a5   : > { %p1857_p9 = pnand %p2906_p11, %p2905_p3 }
 0x5a7   : > { %p1858_p13 = pneg %p1857_p9 }
 0x5a9   : > { %2167 = dma.done.wait (%p1858_p13), %s1480_s10, 2048  }
 0x5aa   : > { %2169 = vsyncadd (%p1858_p13), %s1480_s10, 4294965248  ;;  %p21_p1 = scmp.ge.s32.totalorder %s2298_s11, 4   ;;  %s2907_s15 = smov %s2176_s16 }
 0x5ab   : > { %s2908_s16 = smov %s2180_s17  ;;  %s2909_s17 = smov %s2314_s20 }
 0x5ac   : > { %s2910_s18 = smov %s2298_s11  ;;  %23 = sbr.rel (!%p21_p1) target bundleno = 10 (0xa), region = 102 }
 0x5b1   :  { %1485 = vsyncpa [#allocation3], 1 }
 0x5b2   :  { %1487 = vsyncpa [#allocation3 + $0x1], 1 }
 0x5b3   :  { %1488 = vsyncpa [#allocation6], 1 }
 0x5b4   :  { %1490 = vsyncpa [#allocation6 + $0x1], 1 }
 0x5b5   :  { %1491 = vsyncpa [#allocation9], 1 }
 0x5b6   :  { %1492 = vsyncpa [#allocation4], 1 }
 0x5b7   :  { %1494 = vsyncpa [#allocation4 + $0x1], 1 }

</bundles_post_ra>
